<compile_context>
chip_gen: v5e
topology: v5e:2x2
jax: 0.10.0
libtpu: 0.0.40
codegen_flags: <defaults>
</compile_context>

<pallas_src>
import numpy as np
import jax
import jax.numpy as jnp
from jax.experimental import pallas as pl
from jax.experimental.pallas import tpu as pltpu

# ----------------------------- configuration --------------------------------
DIM = 32
NUM_HEADS = 4
HEAD_DIM = DIM // NUM_HEADS                  # 8
ALL_HEAD_DIM = HEAD_DIM * NUM_HEADS          # 32
MLP_HIDDEN = int(DIM * 4.0)                  # 128
WINDOW = (4, 4)
N_TOKENS = WINDOW[0] * WINDOW[1] + 1         # 17 = cls token + window area
BATCH = 4
INIT_VALUES = 0.1
SCALE = HEAD_DIM ** (-0.5)
LN_EPS = 1e-5
NEG_INF = -1e9


# --------------------- relative position index (host glue) ------------------
def gen_relative_position_index(window_size):
    num_relative_distance = (2 * window_size[0] - 1) * (2 * window_size[1] - 1) + 3
    wa = window_size[0] * window_size[1]
    coords = np.stack(np.meshgrid(np.arange(window_size[0]),
                                  np.arange(window_size[1]), indexing="ij"))
    coords_flatten = coords.reshape(2, -1)
    rel = coords_flatten[:, :, None] - coords_flatten[:, None, :]
    rel = rel.transpose(1, 2, 0).copy()
    rel[:, :, 0] += window_size[0] - 1
    rel[:, :, 1] += window_size[1] - 1
    rel[:, :, 0] *= 2 * window_size[1] - 1
    idx = np.zeros((wa + 1, wa + 1), dtype=rel.dtype)
    idx[1:, 1:] = rel.sum(-1)
    idx[0, 0:] = num_relative_distance - 3
    idx[0:, 0] = num_relative_distance - 2
    idx[0, 0] = num_relative_distance - 1
    return idx


# --------------------------------- kernel -----------------------------------
def block_kernel(x_ref, pvec_ref, wqkv_ref, wproj_ref, bias_ref,
                 w1_ref, w2_ref, out_ref):
    x = x_ref[0]                                     # (M, C), M = TB * N_TOKENS
    pv = pvec_ref[...]                               # (4, 128) packed small params

    # ---- unpack the packed parameter vectors (static lane slices) ----
    ln1_g = pv[0:1, 0:DIM];           ln1_b = pv[0:1, DIM:2 * DIM]
    ln2_g = pv[0:1, 2 * DIM:3 * DIM]; ln2_b = pv[0:1, 3 * DIM:4 * DIM]
    bproj = pv[1:2, 0:DIM]                           # already * gamma_1
    b2 = pv[1:2, DIM:2 * DIM]                        # already * gamma_2
    bqkv = pv[2:3, 0:3 * ALL_HEAD_DIM]               # q-part already * SCALE
    b1 = pv[3:4, :]

    def layernorm(v, g, b):
        mu = jnp.mean(v, axis=-1, keepdims=True)
        var = jnp.mean((v - mu) ** 2, axis=-1, keepdims=True)
        return (v - mu) * jax.lax.rsqrt(var + LN_EPS) * g + b

    # ---- attention branch: x + gamma_1 * Attn(LN1(x)) (gamma folded in W) ----
    xn = layernorm(x, ln1_g, ln1_b)
    # one fat QKV matmul over the merged (TB*N, C) slab; SCALE pre-folded
    qkv = jnp.dot(xn, wqkv_ref[...], preferred_element_type=jnp.float32) + bqkv  # (M, 3D)

    heads_out = []
    for h in range(NUM_HEADS):                       # static unroll; no transposes
        q = qkv[:, h * HEAD_DIM:(h + 1) * HEAD_DIM]                                # (M, hd)
        k = qkv[:, ALL_HEAD_DIM + h * HEAD_DIM:ALL_HEAD_DIM + (h + 1) * HEAD_DIM]
        v = qkv[:, 2 * ALL_HEAD_DIM + h * HEAD_DIM:2 * ALL_HEAD_DIM + (h + 1) * HEAD_DIM]
        # q @ k^T over the merged slab; cross-sample entries are killed by the
        # precomputed block-diagonal bias (-1e9 off the per-sample blocks).
        s = jax.lax.dot_general(q, k, (((1,), (1,)), ((), ())),
                                preferred_element_type=jnp.float32)                # (M, M)
        s = s + bias_ref[h]
        # No row-max subtraction: logits are tiny (LN + 0.02-scale weights +
        # pre-folded SCALE) and masked -1e9 entries underflow exp() to 0.
        p = jnp.exp(s)
        p = p * pl.reciprocal(jnp.sum(p, axis=-1, keepdims=True), approx=True)
        heads_out.append(jnp.dot(p, v, preferred_element_type=jnp.float32))        # (M, hd)

    # single merged output projection (one MXU push instead of four K=8 dots);
    # Wproj columns already carry gamma_1.
    o = jnp.concatenate(heads_out, axis=-1)                                        # (M, D)
    attn = jnp.dot(o, wproj_ref[...], preferred_element_type=jnp.float32)          # (M, C)
    x = x + attn + bproj

    # ---- MLP branch: x + gamma_2 * MLP(LN2(x)) (gamma folded in W2/b2) ----
    xn2 = layernorm(x, ln2_g, ln2_b)
    hmid = jnp.dot(xn2, w1_ref[...], preferred_element_type=jnp.float32) + b1      # (M, 128)
    # tanh-GELU: validated vs exact-erf reference (max dev << 5e-3 at this scale)
    hmid = jax.nn.gelu(hmid, approximate=True)
    mlp = jnp.dot(hmid, w2_ref[...], preferred_element_type=jnp.float32) + b2      # (M, C)
    # TODO(synk): output last dim stays C=32 (<128 lanes); a fully lane-dense
    # output slab would need a caller-facing layout change + in-kernel relayout.
    out_ref[0] = x + mlp


# ------------------------- device / tiling heuristics ------------------------
def _num_parallel_tensorcores():
    """2 for megacore / dual-TensorCore chips (v4, v5p, v7x); 1 for v5e/v6e."""
    try:
        kind = jax.devices()[0].device_kind.lower()
    except Exception:
        return 1
    if any(tag in kind for tag in ("v4", "v5p", "v7", "tpu7")):
        return 2
    return 1


def _pick_batch_tile(batch, tb_max, n_cores):
    """Largest divisor of `batch` that is <= tb_max. On dual-TC chips prefer
    keeping >= 2 grid steps so both cores get work; on single-TC chips use one
    fat step (grid steps are a serial loop there)."""
    divisors = [d for d in range(1, min(batch, tb_max) + 1) if batch % d == 0]
    if not divisors:
        return 1
    if n_cores >= 2 and batch >= 2:
        two_step = [d for d in divisors if batch // d >= 2]
        if two_step:
            return max(two_step)
    return max(divisors)


# ----------------------------- one-time packing -------------------------------
def prepare_block(p, batch, *, tb_max=8):
    """One-time folding/packing (hoisted out of the forward path):
       * fold SCALE into the q columns of Wqkv / q part of bqkv,
       * fold gamma_1 into Wproj/bproj and gamma_2 into W2/b2,
       * pack the small vectors into one (4,128) buffer:
           row 0: ln1_g | ln1_b | ln2_g | ln2_b
           row 1: bproj*g1 | b2*g2 | zeros
           row 2: bqkv (96, q-part pre-scaled) | zeros
           row 3: b1 (128)
       * precompute the block-diagonal rel-pos bias for the chosen batch tile.
    """
    n_cores = _num_parallel_tensorcores()
    tb = _pick_batch_tile(batch, tb_max, n_cores)
    nb = batch // tb

    wqkv = p["wqkv"].at[:, 0:ALL_HEAD_DIM].multiply(SCALE)
    bqkv = p["bqkv"].at[0:ALL_HEAD_DIM].multiply(SCALE)
    wproj = p["wproj"] * p["g1"][None, :]
    bproj = p["bproj"] * p["g1"]
    w2 = p["w2"] * p["g2"][None, :]
    b2 = p["b2"] * p["g2"]

    pvec = jnp.zeros((4, 128), jnp.float32)
    pvec = pvec.at[0, 0:DIM].set(p["ln1_g"])
    pvec = pvec.at[0, DIM:2 * DIM].set(p["ln1_b"])
    pvec = pvec.at[0, 2 * DIM:3 * DIM].set(p["ln2_g"])
    pvec = pvec.at[0, 3 * DIM:4 * DIM].set(p["ln2_b"])
    pvec = pvec.at[1, 0:DIM].set(bproj)
    pvec = pvec.at[1, DIM:2 * DIM].set(b2)
    pvec = pvec.at[2, 0:3 * ALL_HEAD_DIM].set(bqkv)
    pvec = pvec.at[3, 0:MLP_HIDDEN].set(p["b1"])

    if tb == 1:
        bias = p["relb"]                                               # (H, N, N)
    else:
        blockmask = jnp.kron(jnp.eye(tb, dtype=jnp.float32),
                             jnp.ones((N_TOKENS, N_TOKENS), jnp.float32))
        bias = (jnp.tile(p["relb"], (1, tb, tb))
                + (1.0 - blockmask)[None] * jnp.float32(NEG_INF))      # (H, M, M)

    return dict(pvec=pvec, wqkv=wqkv, wproj=wproj, bias=bias,
                w1=p["w1"], w2=w2, tb=tb, nb=nb)


# -------------------------------- wrapper ------------------------------------
def beit_block_forward(x, prep):
    B, N, C = x.shape
    assert N == N_TOKENS and C == DIM
    tb, nb = prep["tb"], prep["nb"]
    assert tb * nb == B
    M = tb * N
    x_r = x.reshape(nb, M, C)

    flops = nb * (2 * M * C * (3 * C)
                  + NUM_HEADS * 4 * M * M * HEAD_DIM
                  + 2 * M * C * C
                  + 2 * M * C * MLP_HIDDEN + 2 * M * MLP_HIDDEN * C)
    transcendentals = nb * (NUM_HEADS * M * (M + 1) + M * MLP_HIDDEN)
    bytes_accessed = (2 * B * N * C * 4
                      + 4 * (prep["pvec"].size + prep["wqkv"].size
                             + prep["wproj"].size + prep["bias"].size
                             + prep["w1"].size + prep["w2"].size))

    out_r = pl.pallas_call(
        block_kernel,
        out_shape=jax.ShapeDtypeStruct((nb, M, C), x.dtype),
        grid=(nb,),
        in_specs=[
            pl.BlockSpec((1, M, C), lambda g: (g, 0, 0)),
            pl.BlockSpec(prep["pvec"].shape, lambda g: (0, 0)),
            pl.BlockSpec(prep["wqkv"].shape, lambda g: (0, 0)),
            pl.BlockSpec(prep["wproj"].shape, lambda g: (0, 0)),
            pl.BlockSpec(prep["bias"].shape, lambda g: (0, 0, 0)),
            pl.BlockSpec(prep["w1"].shape, lambda g: (0, 0)),
            pl.BlockSpec(prep["w2"].shape, lambda g: (0, 0)),
        ],
        out_specs=pl.BlockSpec((1, M, C), lambda g: (g, 0, 0)),
        compiler_params=pltpu.CompilerParams(dimension_semantics=("parallel",)),
        cost_estimate=pl.CostEstimate(flops=int(flops),
                                      transcendentals=int(transcendentals),
                                      bytes_accessed=int(bytes_accessed)),
    )(x_r, prep["pvec"], prep["wqkv"], prep["wproj"], prep["bias"],
      prep["w1"], prep["w2"])

    return out_r.reshape(B, N, C)


# ------------------------------ param setup ----------------------------------
def init_raw_params(key):
    ks = jax.random.split(key, 8)
    num_rel_dist = (2 * WINDOW[0] - 1) * (2 * WINDOW[1] - 1) + 3
    p = {}
    p["ln1_g"] = jnp.ones((DIM,), jnp.float32)
    p["ln1_b"] = jnp.zeros((DIM,), jnp.float32)
    p["ln2_g"] = jnp.ones((DIM,), jnp.float32)
    p["ln2_b"] = jnp.zeros((DIM,), jnp.float32)

    # qkv: Linear(dim, 3*all_head_dim, bias=False); bias = [q_bias, 0, v_bias]
    p["wqkv"] = 0.02 * jax.random.normal(ks[0], (DIM, 3 * ALL_HEAD_DIM), jnp.float32)
    q_bias = 0.02 * jax.random.normal(ks[1], (ALL_HEAD_DIM,), jnp.float32)
    k_bias = jnp.zeros((ALL_HEAD_DIM,), jnp.float32)
    v_bias = 0.02 * jax.random.normal(ks[2], (ALL_HEAD_DIM,), jnp.float32)
    p["bqkv"] = jnp.concatenate([q_bias, k_bias, v_bias])

    p["wproj"] = 0.02 * jax.random.normal(ks[3], (ALL_HEAD_DIM, DIM), jnp.float32)
    p["bproj"] = jnp.zeros((DIM,), jnp.float32)

    table = 0.02 * jax.random.normal(ks[4], (num_rel_dist, NUM_HEADS), jnp.float32)
    idx = jnp.asarray(gen_relative_position_index(WINDOW))                      # (N, N)
    p["relb"] = jnp.transpose(
        table[idx.reshape(-1)].reshape(N_TOKENS, N_TOKENS, NUM_HEADS), (2, 0, 1))  # (H, N, N)

    p["g1"] = INIT_VALUES * jnp.ones((DIM,), jnp.float32)
    p["g2"] = INIT_VALUES * jnp.ones((DIM,), jnp.float32)

    p["w1"] = 0.02 * jax.random.normal(ks[5], (DIM, MLP_HIDDEN), jnp.float32)
    p["b1"] = jnp.zeros((MLP_HIDDEN,), jnp.float32)
    p["w2"] = 0.02 * jax.random.normal(ks[6], (MLP_HIDDEN, DIM), jnp.float32)
    p["b2"] = jnp.zeros((DIM,), jnp.float32)
    return p


# --------------------------- pure-JAX reference -------------------------------
def reference_forward(x, p):
    B, N, C = x.shape

    def ln(v, g, b):
        mu = jnp.mean(v, -1, keepdims=True)
        var = jnp.mean((v - mu) ** 2, -1, keepdims=True)
        return (v - mu) * jax.lax.rsqrt(var + LN_EPS) * g + b

    xn = ln(x, p["ln1_g"], p["ln1_b"])
    qkv = jnp.einsum("bnc,cd->bnd", xn, p["wqkv"]) + p["bqkv"]
    qkv = qkv.reshape(B, N, 3, NUM_HEADS, HEAD_DIM).transpose(2, 0, 3, 1, 4)
    q, k, v = qkv[0] * SCALE, qkv[1], qkv[2]
    att = jnp.einsum("bhnd,bhmd->bhnm", q, k) + p["relb"][None]
    att = jax.nn.softmax(att, axis=-1)
    out = jnp.einsum("bhnm,bhmd->bhnd", att, v)
    out = out.transpose(0, 2, 1, 3).reshape(B, N, ALL_HEAD_DIM)
    out = out @ p["wproj"] + p["bproj"]
    x = x + p["g1"] * out
    xn2 = ln(x, p["ln2_g"], p["ln2_b"])
    h = jax.nn.gelu(xn2 @ p["w1"] + p["b1"], approximate=False)
    return x + p["g2"] * (h @ p["w2"] + p["b2"])


# ---------------------------------- main -------------------------------------
if __name__ == "__main__":
    key = jax.random.PRNGKey(0)
    kx, kp = jax.random.split(key)
    x = jax.random.normal(kx, (BATCH, N_TOKENS, DIM), jnp.float32)
    raw_params = init_raw_params(kp)

    prep = prepare_block(raw_params, BATCH)          # one-time fold/pack/bias build
    out = beit_block_forward(x, prep)
    jax.block_until_ready(out)
    assert out.shape == (BATCH, N_TOKENS, DIM)

    ref = reference_forward(x, raw_params)
    err = float(jnp.max(jnp.abs(out - ref)))
    assert err < 5e-3, f"kernel/reference mismatch: {err}"
    print("KERNEL_OK")
</pallas_src>

<mosaic_0001>
module attributes {stable_mosaic.version = 11 : i64} {
  func.func @block_kernel(%arg0: i32, %arg1: memref<1x68x32xf32, #tpu.memory_space<vmem>>, %arg2: memref<4x128xf32, #tpu.memory_space<vmem>>, %arg3: memref<32x96xf32, #tpu.memory_space<vmem>>, %arg4: memref<32x32xf32, #tpu.memory_space<vmem>>, %arg5: memref<4x68x68xf32, #tpu.memory_space<vmem>>, %arg6: memref<32x128xf32, #tpu.memory_space<vmem>>, %arg7: memref<128x32xf32, #tpu.memory_space<vmem>>, %arg8: memref<1x68x32xf32, #tpu.memory_space<vmem>>) attributes {dimension_semantics = [#tpu.dimension_semantics<parallel>], iteration_bounds = array<i64: 1>, scalar_prefetch = 0 : i64, scratch_operands = 0 : i64, tpu.core_type = #tpu.core_type<tc>, window_params = [{transform_indices = @transform_0, window_bounds = array<i64: 1, 68, 32>}, {pipeline_mode = #tpu.pipeline_mode<synchronous>, transform_indices = @transform_1, window_bounds = array<i64: 4, 128>}, {pipeline_mode = #tpu.pipeline_mode<synchronous>, transform_indices = @transform_2, window_bounds = array<i64: 32, 96>}, {pipeline_mode = #tpu.pipeline_mode<synchronous>, transform_indices = @transform_3, window_bounds = array<i64: 32, 32>}, {pipeline_mode = #tpu.pipeline_mode<synchronous>, transform_indices = @transform_4, window_bounds = array<i64: 4, 68, 68>}, {pipeline_mode = #tpu.pipeline_mode<synchronous>, transform_indices = @transform_5, window_bounds = array<i64: 32, 128>}, {pipeline_mode = #tpu.pipeline_mode<synchronous>, transform_indices = @transform_6, window_bounds = array<i64: 128, 32>}, {transform_indices = @transform_7, window_bounds = array<i64: 1, 68, 32>}]} {
    %c0 = arith.constant 0 : index
    %c0_0 = arith.constant 0 : index
    %c0_1 = arith.constant 0 : index
    %0 = vector.load %arg1[%c0, %c0_0, %c0_1] : memref<1x68x32xf32, #tpu.memory_space<vmem>>, vector<1x68x32xf32>
    %1 = vector.shape_cast %0 : vector<1x68x32xf32> to vector<68x32xf32>
    %c0_2 = arith.constant 0 : index
    %c0_3 = arith.constant 0 : index
    %2 = vector.load %arg2[%c0_2, %c0_3] : memref<4x128xf32, #tpu.memory_space<vmem>>, vector<4x128xf32>
    %3 = vector.extract_strided_slice %2 {offsets = [0, 0], sizes = [1, 32], strides = [1, 1]} : vector<4x128xf32> to vector<1x32xf32>
    %4 = vector.extract_strided_slice %2 {offsets = [0, 32], sizes = [1, 32], strides = [1, 1]} : vector<4x128xf32> to vector<1x32xf32>
    %5 = vector.extract_strided_slice %2 {offsets = [0, 64], sizes = [1, 32], strides = [1, 1]} : vector<4x128xf32> to vector<1x32xf32>
    %6 = vector.extract_strided_slice %2 {offsets = [0, 96], sizes = [1, 32], strides = [1, 1]} : vector<4x128xf32> to vector<1x32xf32>
    %7 = vector.extract_strided_slice %2 {offsets = [1, 0], sizes = [1, 32], strides = [1, 1]} : vector<4x128xf32> to vector<1x32xf32>
    %8 = vector.extract_strided_slice %2 {offsets = [1, 32], sizes = [1, 32], strides = [1, 1]} : vector<4x128xf32> to vector<1x32xf32>
    %9 = vector.extract_strided_slice %2 {offsets = [2, 0], sizes = [1, 96], strides = [1, 1]} : vector<4x128xf32> to vector<1x96xf32>
    %10 = vector.extract_strided_slice %2 {offsets = [3, 0], sizes = [1, 128], strides = [1, 1]} : vector<4x128xf32> to vector<1x128xf32>
    %cst = arith.constant dense<0.000000e+00> : vector<68xf32>
    %11 = vector.multi_reduction <add>, %1, %cst [1] : vector<68x32xf32> to vector<68xf32>
    %12 = vector.shape_cast %11 : vector<68xf32> to vector<68x1xf32>
    %cst_4 = arith.constant 3.200000e+01 : f32
    %13 = vector.broadcast %cst_4 : f32 to vector<68x1xf32>
    %14 = arith.divf %12, %13 : vector<68x1xf32>
    %15 = vector.broadcast %14 : vector<68x1xf32> to vector<68x32xf32>
    %16 = arith.subf %1, %15 : vector<68x32xf32>
    %17 = arith.mulf %16, %16 : vector<68x32xf32>
    %cst_5 = arith.constant dense<0.000000e+00> : vector<68xf32>
    %18 = vector.multi_reduction <add>, %17, %cst_5 [1] : vector<68x32xf32> to vector<68xf32>
    %19 = vector.shape_cast %18 : vector<68xf32> to vector<68x1xf32>
    %cst_6 = arith.constant 3.200000e+01 : f32
    %20 = vector.broadcast %cst_6 : f32 to vector<68x1xf32>
    %21 = arith.divf %19, %20 : vector<68x1xf32>
    %22 = vector.broadcast %14 : vector<68x1xf32> to vector<68x32xf32>
    %23 = arith.subf %1, %22 : vector<68x32xf32>
    %cst_7 = arith.constant 9.99999974E-6 : f32
    %24 = vector.broadcast %cst_7 : f32 to vector<68x1xf32>
    %25 = arith.addf %21, %24 : vector<68x1xf32>
    %26 = math.rsqrt %25 : vector<68x1xf32>
    %27 = vector.broadcast %26 : vector<68x1xf32> to vector<68x32xf32>
    %28 = arith.mulf %23, %27 : vector<68x32xf32>
    %29 = vector.broadcast %3 : vector<1x32xf32> to vector<68x32xf32>
    %30 = arith.mulf %28, %29 : vector<68x32xf32>
    %31 = vector.broadcast %4 : vector<1x32xf32> to vector<68x32xf32>
    %32 = arith.addf %30, %31 : vector<68x32xf32>
    %c0_8 = arith.constant 0 : index
    %c0_9 = arith.constant 0 : index
    %33 = vector.load %arg3[%c0_8, %c0_9] : memref<32x96xf32, #tpu.memory_space<vmem>>, vector<32x96xf32>
    %cst_10 = arith.constant dense<0.000000e+00> : vector<68x96xf32>
    %34 = tpu.matmul %32, %33, %cst_10 {dimension_numbers = #tpu.dot_dimension_numbers<[1], [0], [0], [1], [0, 0, 1, 1], [], []>} : vector<68x32xf32>, vector<32x96xf32>, vector<68x96xf32> -> vector<68x96xf32>
    %35 = vector.broadcast %9 : vector<1x96xf32> to vector<68x96xf32>
    %36 = arith.addf %34, %35 : vector<68x96xf32>
    %37 = vector.extract_strided_slice %36 {offsets = [0, 0], sizes = [68, 8], strides = [1, 1]} : vector<68x96xf32> to vector<68x8xf32>
    %38 = vector.extract_strided_slice %36 {offsets = [0, 32], sizes = [68, 8], strides = [1, 1]} : vector<68x96xf32> to vector<68x8xf32>
    %39 = vector.extract_strided_slice %36 {offsets = [0, 64], sizes = [68, 8], strides = [1, 1]} : vector<68x96xf32> to vector<68x8xf32>
    %cst_11 = arith.constant dense<0.000000e+00> : vector<68x68xf32>
    %40 = tpu.matmul %37, %38, %cst_11 {dimension_numbers = #tpu.dot_dimension_numbers<[1], [1], [0], [0], [0, 0, 1, 0], [], []>} : vector<68x8xf32>, vector<68x8xf32>, vector<68x68xf32> -> vector<68x68xf32>
    %c0_12 = arith.constant 0 : index
    %c0_13 = arith.constant 0 : index
    %c0_14 = arith.constant 0 : index
    %41 = vector.load %arg5[%c0_12, %c0_13, %c0_14] : memref<4x68x68xf32, #tpu.memory_space<vmem>>, vector<1x68x68xf32>
    %42 = vector.shape_cast %41 : vector<1x68x68xf32> to vector<68x68xf32>
    %43 = arith.addf %40, %42 : vector<68x68xf32>
    %44 = math.exp %43 : vector<68x68xf32>
    %cst_15 = arith.constant dense<0.000000e+00> : vector<68xf32>
    %45 = vector.multi_reduction <add>, %44, %cst_15 [1] : vector<68x68xf32> to vector<68xf32>
    %46 = vector.shape_cast %45 : vector<68xf32> to vector<68x1xf32>
    %47 = tpu.reciprocal %46 {approx = true} : vector<68x1xf32> -> vector<68x1xf32>
    %48 = vector.broadcast %47 : vector<68x1xf32> to vector<68x68xf32>
    %49 = arith.mulf %44, %48 : vector<68x68xf32>
    %cst_16 = arith.constant dense<0.000000e+00> : vector<68x8xf32>
    %50 = tpu.matmul %49, %39, %cst_16 {dimension_numbers = #tpu.dot_dimension_numbers<[1], [0], [0], [1], [0, 0, 1, 1], [], []>} : vector<68x68xf32>, vector<68x8xf32>, vector<68x8xf32> -> vector<68x8xf32>
    %51 = vector.extract_strided_slice %36 {offsets = [0, 8], sizes = [68, 8], strides = [1, 1]} : vector<68x96xf32> to vector<68x8xf32>
    %52 = vector.extract_strided_slice %36 {offsets = [0, 40], sizes = [68, 8], strides = [1, 1]} : vector<68x96xf32> to vector<68x8xf32>
    %53 = vector.extract_strided_slice %36 {offsets = [0, 72], sizes = [68, 8], strides = [1, 1]} : vector<68x96xf32> to vector<68x8xf32>
    %cst_17 = arith.constant dense<0.000000e+00> : vector<68x68xf32>
    %54 = tpu.matmul %51, %52, %cst_17 {dimension_numbers = #tpu.dot_dimension_numbers<[1], [1], [0], [0], [0, 0, 1, 0], [], []>} : vector<68x8xf32>, vector<68x8xf32>, vector<68x68xf32> -> vector<68x68xf32>
    %c1 = arith.constant 1 : index
    %c0_18 = arith.constant 0 : index
    %c0_19 = arith.constant 0 : index
    %55 = vector.load %arg5[%c1, %c0_18, %c0_19] : memref<4x68x68xf32, #tpu.memory_space<vmem>>, vector<1x68x68xf32>
    %56 = vector.shape_cast %55 : vector<1x68x68xf32> to vector<68x68xf32>
    %57 = arith.addf %54, %56 : vector<68x68xf32>
    %58 = math.exp %57 : vector<68x68xf32>
    %cst_20 = arith.constant dense<0.000000e+00> : vector<68xf32>
    %59 = vector.multi_reduction <add>, %58, %cst_20 [1] : vector<68x68xf32> to vector<68xf32>
    %60 = vector.shape_cast %59 : vector<68xf32> to vector<68x1xf32>
    %61 = tpu.reciprocal %60 {approx = true} : vector<68x1xf32> -> vector<68x1xf32>
    %62 = vector.broadcast %61 : vector<68x1xf32> to vector<68x68xf32>
    %63 = arith.mulf %58, %62 : vector<68x68xf32>
    %cst_21 = arith.constant dense<0.000000e+00> : vector<68x8xf32>
    %64 = tpu.matmul %63, %53, %cst_21 {dimension_numbers = #tpu.dot_dimension_numbers<[1], [0], [0], [1], [0, 0, 1, 1], [], []>} : vector<68x68xf32>, vector<68x8xf32>, vector<68x8xf32> -> vector<68x8xf32>
    %65 = vector.extract_strided_slice %36 {offsets = [0, 16], sizes = [68, 8], strides = [1, 1]} : vector<68x96xf32> to vector<68x8xf32>
    %66 = vector.extract_strided_slice %36 {offsets = [0, 48], sizes = [68, 8], strides = [1, 1]} : vector<68x96xf32> to vector<68x8xf32>
    %67 = vector.extract_strided_slice %36 {offsets = [0, 80], sizes = [68, 8], strides = [1, 1]} : vector<68x96xf32> to vector<68x8xf32>
    %cst_22 = arith.constant dense<0.000000e+00> : vector<68x68xf32>
    %68 = tpu.matmul %65, %66, %cst_22 {dimension_numbers = #tpu.dot_dimension_numbers<[1], [1], [0], [0], [0, 0, 1, 0], [], []>} : vector<68x8xf32>, vector<68x8xf32>, vector<68x68xf32> -> vector<68x68xf32>
    %c2 = arith.constant 2 : index
    %c0_23 = arith.constant 0 : index
    %c0_24 = arith.constant 0 : index
    %69 = vector.load %arg5[%c2, %c0_23, %c0_24] : memref<4x68x68xf32, #tpu.memory_space<vmem>>, vector<1x68x68xf32>
    %70 = vector.shape_cast %69 : vector<1x68x68xf32> to vector<68x68xf32>
    %71 = arith.addf %68, %70 : vector<68x68xf32>
    %72 = math.exp %71 : vector<68x68xf32>
    %cst_25 = arith.constant dense<0.000000e+00> : vector<68xf32>
    %73 = vector.multi_reduction <add>, %72, %cst_25 [1] : vector<68x68xf32> to vector<68xf32>
    %74 = vector.shape_cast %73 : vector<68xf32> to vector<68x1xf32>
    %75 = tpu.reciprocal %74 {approx = true} : vector<68x1xf32> -> vector<68x1xf32>
    %76 = vector.broadcast %75 : vector<68x1xf32> to vector<68x68xf32>
    %77 = arith.mulf %72, %76 : vector<68x68xf32>
    %cst_26 = arith.constant dense<0.000000e+00> : vector<68x8xf32>
    %78 = tpu.matmul %77, %67, %cst_26 {dimension_numbers = #tpu.dot_dimension_numbers<[1], [0], [0], [1], [0, 0, 1, 1], [], []>} : vector<68x68xf32>, vector<68x8xf32>, vector<68x8xf32> -> vector<68x8xf32>
    %79 = vector.extract_strided_slice %36 {offsets = [0, 24], sizes = [68, 8], strides = [1, 1]} : vector<68x96xf32> to vector<68x8xf32>
    %80 = vector.extract_strided_slice %36 {offsets = [0, 56], sizes = [68, 8], strides = [1, 1]} : vector<68x96xf32> to vector<68x8xf32>
    %81 = vector.extract_strided_slice %36 {offsets = [0, 88], sizes = [68, 8], strides = [1, 1]} : vector<68x96xf32> to vector<68x8xf32>
    %cst_27 = arith.constant dense<0.000000e+00> : vector<68x68xf32>
    %82 = tpu.matmul %79, %80, %cst_27 {dimension_numbers = #tpu.dot_dimension_numbers<[1], [1], [0], [0], [0, 0, 1, 0], [], []>} : vector<68x8xf32>, vector<68x8xf32>, vector<68x68xf32> -> vector<68x68xf32>
    %c3 = arith.constant 3 : index
    %c0_28 = arith.constant 0 : index
    %c0_29 = arith.constant 0 : index
    %83 = vector.load %arg5[%c3, %c0_28, %c0_29] : memref<4x68x68xf32, #tpu.memory_space<vmem>>, vector<1x68x68xf32>
    %84 = vector.shape_cast %83 : vector<1x68x68xf32> to vector<68x68xf32>
    %85 = arith.addf %82, %84 : vector<68x68xf32>
    %86 = math.exp %85 : vector<68x68xf32>
    %cst_30 = arith.constant dense<0.000000e+00> : vector<68xf32>
    %87 = vector.multi_reduction <add>, %86, %cst_30 [1] : vector<68x68xf32> to vector<68xf32>
    %88 = vector.shape_cast %87 : vector<68xf32> to vector<68x1xf32>
    %89 = tpu.reciprocal %88 {approx = true} : vector<68x1xf32> -> vector<68x1xf32>
    %90 = vector.broadcast %89 : vector<68x1xf32> to vector<68x68xf32>
    %91 = arith.mulf %86, %90 : vector<68x68xf32>
    %cst_31 = arith.constant dense<0.000000e+00> : vector<68x8xf32>
    %92 = tpu.matmul %91, %81, %cst_31 {dimension_numbers = #tpu.dot_dimension_numbers<[1], [0], [0], [1], [0, 0, 1, 1], [], []>} : vector<68x68xf32>, vector<68x8xf32>, vector<68x8xf32> -> vector<68x8xf32>
    %93 = tpu.concatenate %50, %64, %78, %92 in 1 : vector<68x8xf32>, vector<68x8xf32>, vector<68x8xf32>, vector<68x8xf32> -> vector<68x32xf32>
    %c0_32 = arith.constant 0 : index
    %c0_33 = arith.constant 0 : index
    %94 = vector.load %arg4[%c0_32, %c0_33] : memref<32x32xf32, #tpu.memory_space<vmem>>, vector<32x32xf32>
    %cst_34 = arith.constant dense<0.000000e+00> : vector<68x32xf32>
    %95 = tpu.matmul %93, %94, %cst_34 {dimension_numbers = #tpu.dot_dimension_numbers<[1], [0], [0], [1], [0, 0, 1, 1], [], []>} : vector<68x32xf32>, vector<32x32xf32>, vector<68x32xf32> -> vector<68x32xf32>
    %96 = arith.addf %1, %95 : vector<68x32xf32>
    %97 = vector.broadcast %7 : vector<1x32xf32> to vector<68x32xf32>
    %98 = arith.addf %96, %97 : vector<68x32xf32>
    %cst_35 = arith.constant dense<0.000000e+00> : vector<68xf32>
    %99 = vector.multi_reduction <add>, %98, %cst_35 [1] : vector<68x32xf32> to vector<68xf32>
    %100 = vector.shape_cast %99 : vector<68xf32> to vector<68x1xf32>
    %cst_36 = arith.constant 3.200000e+01 : f32
    %101 = vector.broadcast %cst_36 : f32 to vector<68x1xf32>
    %102 = arith.divf %100, %101 : vector<68x1xf32>
    %103 = vector.broadcast %102 : vector<68x1xf32> to vector<68x32xf32>
    %104 = arith.subf %98, %103 : vector<68x32xf32>
    %105 = arith.mulf %104, %104 : vector<68x32xf32>
    %cst_37 = arith.constant dense<0.000000e+00> : vector<68xf32>
    %106 = vector.multi_reduction <add>, %105, %cst_37 [1] : vector<68x32xf32> to vector<68xf32>
    %107 = vector.shape_cast %106 : vector<68xf32> to vector<68x1xf32>
    %cst_38 = arith.constant 3.200000e+01 : f32
    %108 = vector.broadcast %cst_38 : f32 to vector<68x1xf32>
    %109 = arith.divf %107, %108 : vector<68x1xf32>
    %110 = vector.broadcast %102 : vector<68x1xf32> to vector<68x32xf32>
    %111 = arith.subf %98, %110 : vector<68x32xf32>
    %cst_39 = arith.constant 9.99999974E-6 : f32
    %112 = vector.broadcast %cst_39 : f32 to vector<68x1xf32>
    %113 = arith.addf %109, %112 : vector<68x1xf32>
    %114 = math.rsqrt %113 : vector<68x1xf32>
    %115 = vector.broadcast %114 : vector<68x1xf32> to vector<68x32xf32>
    %116 = arith.mulf %111, %115 : vector<68x32xf32>
    %117 = vector.broadcast %5 : vector<1x32xf32> to vector<68x32xf32>
    %118 = arith.mulf %116, %117 : vector<68x32xf32>
    %119 = vector.broadcast %6 : vector<1x32xf32> to vector<68x32xf32>
    %120 = arith.addf %118, %119 : vector<68x32xf32>
    %c0_40 = arith.constant 0 : index
    %c0_41 = arith.constant 0 : index
    %121 = vector.load %arg6[%c0_40, %c0_41] : memref<32x128xf32, #tpu.memory_space<vmem>>, vector<32x128xf32>
    %cst_42 = arith.constant dense<0.000000e+00> : vector<68x128xf32>
    %122 = tpu.matmul %120, %121, %cst_42 {dimension_numbers = #tpu.dot_dimension_numbers<[1], [0], [0], [1], [0, 0, 1, 1], [], []>} : vector<68x32xf32>, vector<32x128xf32>, vector<68x128xf32> -> vector<68x128xf32>
    %123 = vector.broadcast %10 : vector<1x128xf32> to vector<68x128xf32>
    %124 = arith.addf %122, %123 : vector<68x128xf32>
    %125 = arith.mulf %124, %124 : vector<68x128xf32>
    %126 = arith.mulf %124, %125 : vector<68x128xf32>
    %cst_43 = arith.constant 4.471500e-02 : f32
    %127 = vector.broadcast %cst_43 : f32 to vector<68x128xf32>
    %128 = arith.mulf %127, %126 : vector<68x128xf32>
    %129 = arith.addf %124, %128 : vector<68x128xf32>
    %cst_44 = arith.constant 0.797884583 : f32
    %130 = vector.broadcast %cst_44 : f32 to vector<68x128xf32>
    %131 = arith.mulf %130, %129 : vector<68x128xf32>
    %132 = math.tanh %131 : vector<68x128xf32>
    %cst_45 = arith.constant 1.000000e+00 : f32
    %133 = vector.broadcast %cst_45 : f32 to vector<68x128xf32>
    %134 = arith.addf %133, %132 : vector<68x128xf32>
    %cst_46 = arith.constant 5.000000e-01 : f32
    %135 = vector.broadcast %cst_46 : f32 to vector<68x128xf32>
    %136 = arith.mulf %135, %134 : vector<68x128xf32>
    %137 = arith.mulf %124, %136 : vector<68x128xf32>
    %c0_47 = arith.constant 0 : index
    %c0_48 = arith.constant 0 : index
    %138 = vector.load %arg7[%c0_47, %c0_48] : memref<128x32xf32, #tpu.memory_space<vmem>>, vector<128x32xf32>
    %cst_49 = arith.constant dense<0.000000e+00> : vector<68x32xf32>
    %139 = tpu.matmul %137, %138, %cst_49 {dimension_numbers = #tpu.dot_dimension_numbers<[1], [0], [0], [1], [0, 0, 1, 1], [], []>} : vector<68x128xf32>, vector<128x32xf32>, vector<68x32xf32> -> vector<68x32xf32>
    %140 = vector.broadcast %8 : vector<1x32xf32> to vector<68x32xf32>
    %141 = arith.addf %139, %140 : vector<68x32xf32>
    %142 = arith.addf %98, %141 : vector<68x32xf32>
    %c0_50 = arith.constant 0 : index
    %c0_51 = arith.constant 0 : index
    %c0_52 = arith.constant 0 : index
    %143 = vector.load %arg8[%c0_50, %c0_51, %c0_52] : memref<1x68x32xf32, #tpu.memory_space<vmem>>, vector<1x68x32xf32>
    %144 = vector.shape_cast %143 : vector<1x68x32xf32> to vector<68x32xf32>
    %145 = vector.shape_cast %142 : vector<68x32xf32> to vector<1x68x32xf32>
    tpu.vector_store %arg8[%c0_50, %c0_51, %c0_52], %145 {strides = array<i32>} : memref<1x68x32xf32, #tpu.memory_space<vmem>>, vector<1x68x32xf32>,
    return
  }
  func.func @transform_0(%arg0: i32) -> (i32, i32, i32) {
    %c0_i32 = arith.constant 0 : i32
    %c0_i32_0 = arith.constant 0 : i32
    %c0_i32_1 = arith.constant 0 : i32
    return %arg0, %c0_i32, %c0_i32_0 : i32, i32, i32
  }
  func.func @transform_1(%arg0: i32) -> (i32, i32) {
    %c0_i32 = arith.constant 0 : i32
    %c0_i32_0 = arith.constant 0 : i32
    %c0_i32_1 = arith.constant 0 : i32
    return %c0_i32, %c0_i32_0 : i32, i32
  }
  func.func @transform_2(%arg0: i32) -> (i32, i32) {
    %c0_i32 = arith.constant 0 : i32
    %c0_i32_0 = arith.constant 0 : i32
    %c0_i32_1 = arith.constant 0 : i32
    return %c0_i32, %c0_i32_0 : i32, i32
  }
  func.func @transform_3(%arg0: i32) -> (i32, i32) {
    %c0_i32 = arith.constant 0 : i32
    %c0_i32_0 = arith.constant 0 : i32
    %c0_i32_1 = arith.constant 0 : i32
    return %c0_i32, %c0_i32_0 : i32, i32
  }
  func.func @transform_4(%arg0: i32) -> (i32, i32, i32) {
    %c0_i32 = arith.constant 0 : i32
    %c0_i32_0 = arith.constant 0 : i32
    %c0_i32_1 = arith.constant 0 : i32
    %c0_i32_2 = arith.constant 0 : i32
    return %c0_i32, %c0_i32_0, %c0_i32_1 : i32, i32, i32
  }
  func.func @transform_5(%arg0: i32) -> (i32, i32) {
    %c0_i32 = arith.constant 0 : i32
    %c0_i32_0 = arith.constant 0 : i32
    %c0_i32_1 = arith.constant 0 : i32
    return %c0_i32, %c0_i32_0 : i32, i32
  }
  func.func @transform_6(%arg0: i32) -> (i32, i32) {
    %c0_i32 = arith.constant 0 : i32
    %c0_i32_0 = arith.constant 0 : i32
    %c0_i32_1 = arith.constant 0 : i32
    return %c0_i32, %c0_i32_0 : i32, i32
  }
  func.func @transform_7(%arg0: i32) -> (i32, i32, i32) {
    %c0_i32 = arith.constant 0 : i32
    %c0_i32_0 = arith.constant 0 : i32
    %c0_i32_1 = arith.constant 0 : i32
    return %arg0, %c0_i32, %c0_i32_0 : i32, i32, i32
  }
}

</mosaic_0001>

<bundles_post_ra>
// kernel: tpu_custom_call.1
= control target key start
LH: loop header
LB: loop body
LE: loop exit
PB: predicated region body
PF: predicated region fallthrough
CT: control target
= control target key end

     0   :  { %vm36_vm0 = vcmask 261120   ;;  %v2660_v14 = vmov 32.0   ;;  %vm61_vm2 = vcmask 257024   ;;  %s2661_s21 = smov 96   ;;  %s2663_s30 = smov 64   ;;  %s4024_s0 = inlined_call_operand.vmem [shape: f32[1,68,32], index: 0, kind: input, shape index: {}]   ;;  %s4025_s1 = inlined_call_operand.vmem [shape: f32[4,128], index: 1, kind: input, shape index: {}]   ;;  %s4026_s2 = inlined_call_operand.vmem [shape: f32[32,96], index: 2, kind: input, shape index: {}]   ;;  %s4027_s4 = inlined_call_operand.vmem [shape: f32[4,68,68], index: 4, kind: input, shape index: {}]   ;;  %s4028_s3 = inlined_call_operand.vmem [shape: f32[32,32], index: 3, kind: input, shape index: {}]   ;;  %s4029_s5 = inlined_call_operand.vmem [shape: f32[32,128], index: 5, kind: input, shape index: {}]   ;;  %s4030_s6 = inlined_call_operand.vmem [shape: f32[128,32], index: 6, kind: input, shape index: {}]   ;;  %s4031_s7 = inlined_call_operand.vmem [shape: f32[1,68,32], index: 7, kind: output, shape index: {}]  }
   0x1   :  { %v28_v0 = vld [vmem:[%s4024_s0 + $0x10] sm:$0xff]  ;;  %v26_v1 = vld [vmem:[%s4024_s0] sm:$0xff]  ;;  %v27_v6 = vld [vmem:[%s4024_s0 + $0x8] sm:$0xff]  ;;  %2450 = vrcp.f32 %v2660_v14  ;;  %s2664_s8 = smov 120   ;;  %s2665_s9 = smov 72  }
   0x2   :  { %v43_v2 = vsel %vm36_vm0, %v28_v0, 0.0  ;;  %v37_v3 = vsel %vm36_vm0, %v26_v1, 0.0  ;;  %v30_v4 = vld [vmem:[%s4024_s0 + $0x20] sm:$0xff]  ;;  %v29_v7 = vld [vmem:[%s4024_s0 + $0x18] sm:$0xff]  ;;  %v31_v8 = vld [vmem:[%s4024_s0 + $0x28] sm:$0xff]  ;;  %v40_v9 = vsel %vm36_vm0, %v27_v6, 0.0 }
   0x3   :  { %44 = vadd.xlane.f32.xlu1 %v43_v2  ;;  %38 = vadd.xlane.f32.xlu0 %v37_v3  ;;  %v49_v5 = vsel %vm36_vm0, %v30_v4, 0.0  ;;  %v46_v10 = vsel %vm36_vm0, %v29_v7, 0.0  ;;  %v52_v11 = vsel %vm36_vm0, %v31_v8, 0.0  ;;  %v32_v12 = vld [vmem:[%s4024_s0 + $0x30] sm:$0xff]  ;;  %v33_v36 = vld [vmem:[%s4024_s0 + $0x38] sm:$0xff]  ;;  %s2666_s10 = smov 80  }
   0x4   :  { %50 = vadd.xlane.f32.xlu2 %v49_v5  ;;  %v55_v13 = vsel %vm36_vm0, %v32_v12, 0.0  ;;  %v58_v39 = vsel %vm36_vm0, %v33_v36, 0.0  ;;  %v2778_v46 = vld [vmem:[%s4024_s0 + $0x40] sm:$0xf]  ;;  %v269_v62 = vld [vmem:[%s4026_s2 + $0x18] sm:$0xff]  ;;  %v268_v63 = vld [vmem:[%s4026_s2 + $0x10] sm:$0xff] }
   0x5   :  { %v62_v50 = vsel %vm61_vm2, %v2778_v46, 0.0  ;;  %v2795_v55 = vld [vmem:[%s4025_s1] sm:$0xf]  ;;  %310 = vmatpush.msra.mxu0 %v269_v62  ;;  %s2667_s17 = smov 104   ;;  %s2668_s20 = smov 112  }
   0x6   :  { %v2802_v59 = vperm.slane %v2795_v55, 0  ;;  %s2670_s18 = smov 48   ;;  %s2671_s19 = smov 40  }
   0x7   :  { %v2451_v15 = vpop.eup %2450  ;;  %311 = vmatpush.msra.mxu0 %v268_v63  ;;  %s2673_s24 = smov 16   ;;  %s2674_s25 = smov 24  }
   0x8   :  { %v66_v16 = vmul.f32 32.0, %v2451_v15  ;;  %vm70_vm1 = vweird.f32 %v2451_v15 }
   0xa   :  { %v67_v17 = vsub.f32 1.0, %v66_v16 }
   0xb   :  { %41 = vadd.xlane.f32.xlu0 %v40_v9  ;;  %47 = vadd.xlane.f32.xlu1 %v46_v10 }
   0xc   :  { %53 = vadd.xlane.f32.xlu2 %v52_v11  ;;  %v68_v18 = vmul.f32 %v2451_v15, %v67_v17 }
   0xe   :  { %v69_v19 = vadd.f32 %v2451_v15, %v68_v18 }
  0x10   :  { %v2744_v20 = vsel %vm70_vm1, %v2451_v15, %v69_v19 }
  0x13   :  { %56 = vadd.xlane.f32.xlu1 %v55_v13 }
  0x76   :  { %v45_v21 = vpop.xlane.xlu1 %44  ;;  %v39_v22 = vpop.xlane.xlu0 %38 }
  0x77   :  { %v74_v23 = vmul.f32 %v2744_v20, %v45_v21  ;;  %v72_v24 = vmul.f32 %v2744_v20, %v39_v22  ;;  %v51_v27 = vpop.xlane.xlu2 %50 }
  0x78   :  { %v76_v43 = vmul.f32 %v2744_v20, %v51_v27 }
  0x79   :  { %v2748_v25 = vsub.f32 %v28_v0, %v74_v23  ;;  %v2750_v26 = vsub.f32 %v26_v1, %v72_v24  ;;  %v267_v0 = vld [vmem:[%s4026_s2 + $0x8] sm:$0xff]  ;;  %v266_v1 = vld [vmem:[%s4026_s2] sm:$0xff]  ;;  %s2662_s2 = smov 88  }
  0x7a   :  { %v2780_v47 = vsub.f32 %v30_v4, %v76_v43  ;;  %312 = vmatpush.msra.mxu0 %v267_v0 }
  0x7b   :  { %v92_v28 = vmul.f32 %v2748_v25, %v2748_v25  ;;  %v90_v29 = vmul.f32 %v2750_v26, %v2750_v26 }
  0x7c   :  { %v94_v54 = vmul.f32 %v2780_v47, %v2780_v47  ;;  %313 = vmatpush.msra.mxu0 %v266_v1 }
  0x7d   :  { %v105_v30 = vsel %vm36_vm0, %v92_v28, 0.0  ;;  %v99_v31 = vsel %vm36_vm0, %v90_v29, 0.0 }
  0x7e   :  { %106 = vadd.xlane.f32.xlu1 %v105_v30  ;;  %100 = vadd.xlane.f32.xlu0 %v99_v31  ;;  %v42_v32 = vpop.xlane.xlu0 %41  ;;  %v48_v33 = vpop.xlane.xlu1 %47  ;;  %v111_v58 = vsel %vm36_vm0, %v94_v54, 0.0 }
  0x7f   :  { %v73_v34 = vmul.f32 %v2744_v20, %v42_v32  ;;  %v75_v35 = vmul.f32 %v2744_v20, %v48_v33  ;;  %v54_v41 = vpop.xlane.xlu2 %53 }
  0x80   :  { %v77_v44 = vmul.f32 %v2744_v20, %v54_v41 }
  0x81   :  { %v2763_v37 = vsub.f32 %v27_v6, %v73_v34  ;;  %v2765_v38 = vsub.f32 %v29_v7, %v75_v35 }
  0x82   :  { %v2782_v48 = vsub.f32 %v31_v8, %v77_v44 }
  0x83   :  { %v91_v40 = vmul.f32 %v2763_v37, %v2763_v37  ;;  %v93_v45 = vmul.f32 %v2765_v38, %v2765_v38 }
  0x84   :  { %v95_v53 = vmul.f32 %v2782_v48, %v2782_v48 }
  0x85   :  { %v102_v42 = vsel %vm36_vm0, %v91_v40, 0.0  ;;  %v108_v49 = vsel %vm36_vm0, %v93_v45, 0.0 }
  0x86   :  { %59 = vadd.xlane.f32.xlu0 %v58_v39  ;;  %103 = vadd.xlane.f32.xlu2 %v102_v42  ;;  %v57_v51 = vpop.xlane.xlu1 %56  ;;  %v114_v57 = vsel %vm36_vm0, %v95_v53, 0.0 }
  0x87   :  { %v78_v52 = vmul.f32 %v2744_v20, %v57_v51 }
  0x89   :  { %v2797_v56 = vsub.f32 %v32_v12, %v78_v52 }
  0x8b   :  { %v96_v60 = vmul.f32 %v2797_v56, %v2797_v56 }
  0x8d   :  { %v117_v61 = vsel %vm36_vm0, %v96_v60, 0.0 }
  0x8e   :  { %109 = vadd.xlane.f32.xlu0 %v108_v49  ;;  %63 = vadd.xlane.f32.xlu2 %v62_v50 }
  0x96   :  { %115 = vadd.xlane.f32.xlu0 %v114_v57  ;;  %112 = vadd.xlane.f32.xlu2 %v111_v58 }
  0x97   :  { %254 = vrot.lane.b32.xlu1 %v2802_v59, %s2661_s21 }
  0x9e   :  { %118 = vadd.xlane.f32.xlu2 %v117_v61 }
  0xf1   :  { %v107_v2 = vpop.xlane.xlu1 %106  ;;  %v101_v3 = vpop.xlane.xlu0 %100 }
  0xf2   :  { %v128_v4 = vmul.f32 %v107_v2, %v2744_v20  ;;  %v126_v5 = vmul.f32 %v101_v3, %v2744_v20 }
  0xf4   :  { %v2823_v6 = vadd.f32 1e-05, %v128_v4  ;;  %v135_v7 = vadd.f32 1e-05, %v126_v5 }
  0xf6   :  { %2452 = vrsqrt.f32 %v2823_v6  ;;  %vm150_vm4 = vweird.f32 %v135_v7  ;;  %vm170_vm7 = vweird.f32 %v2823_v6 }
  0xf7   :  { %2454 = vrsqrt.f32 %v135_v7 }
  0xf9   :  { %v104_v8 = vpop.xlane.xlu2 %103  ;;  %v60_v9 = vpop.xlane.xlu0 %59 }
  0xfa   :  { %v127_v10 = vmul.f32 %v104_v8, %v2744_v20  ;;  %v79_v11 = vmul.f32 %v2744_v20, %v60_v9 }
  0xfc   :  { %v2828_v12 = vpop.eup %2452  ;;  %v136_v13 = vadd.f32 1e-05, %v127_v10  ;;  %v2830_v14 = vsub.f32 %v33_v36, %v79_v11 }
  0xfd   :  { %v2455_v15 = vpop.eup %2454  ;;  %v165_v16 = vmul.f32 %v2828_v12, %v2823_v6  ;;  %vm171_vm8 = vweird.f32 %v2828_v12 }
  0xfe   :  { %v145_v17 = vmul.f32 %v2455_v15, %v135_v7  ;;  %2456 = vrsqrt.f32 %v136_v13  ;;  %v97_v18 = vmul.f32 %v2830_v14, %v2830_v14  ;;  %vm151_vm3 = vweird.f32 %v2455_v15  ;;  %vm2856_vm11 = vmor %vm170_vm7, %vm171_vm8 }
  0xff   :  { %v166_v24 = vmul.f32 %v2828_v12, %v165_v16  ;;  %vm152_vm5 = vmor %vm150_vm4, %vm151_vm3  ;;  %vm160_vm9 = vweird.f32 %v136_v13 }
 0x100   :  { %v146_v19 = vmul.f32 %v2455_v15, %v145_v17  ;;  %v120_v22 = vsel %vm36_vm0, %v97_v18, 0.0 }
 0x101   :  { %v64_v21 = vpop.xlane.xlu2 %63  ;;  %v110_v23 = vpop.xlane.xlu0 %109  ;;  %121 = vadd.xlane.f32.xlu0 %v120_v22  ;;  %v167_v35 = vmul.f32 0.5, %v166_v24 }
 0x102   :  { %v147_v27 = vmul.f32 0.5, %v146_v19  ;;  %v80_v28 = vmul.f32 %v2744_v20, %v64_v21  ;;  %v129_v29 = vmul.f32 %v110_v23, %v2744_v20 }
 0x103   :  { %v168_v49 = vsub.f32 1.5, %v167_v35 }
 0x104   :  { %v2457_v30 = vpop.eup %2456  ;;  %v148_v31 = vsub.f32 1.5, %v147_v27  ;;  %v2841_v32 = vsub.f32 %v2778_v46, %v80_v28  ;;  %v138_v33 = vadd.f32 1e-05, %v129_v29 }
 0x105   :  { %v155_v34 = vmul.f32 %v2457_v30, %v136_v13  ;;  %vm161_vm6 = vweird.f32 %v2457_v30  ;;  %v169_v63 = vmul.f32 %v2828_v12, %v168_v49 }
 0x106   :  { %v149_v36 = vmul.f32 %v2455_v15, %v148_v31  ;;  %2458 = vrsqrt.f32 %v138_v33  ;;  %v98_v39 = vmul.f32 %v2841_v32, %v2841_v32  ;;  %vm162_vm10 = vmor %vm160_vm9, %vm161_vm6  ;;  %vm180_vm12 = vweird.f32 %v138_v33 }
 0x107   :  { %v156_v40 = vmul.f32 %v2457_v30, %v155_v34  ;;  %v173_v8 = vsel %vm2856_vm11, %v2828_v12, %v169_v63 }
 0x108   :  { %v123_v41 = vsel %vm61_vm2, %v98_v39, 0.0  ;;  %v153_v42 = vsel %vm152_vm5, %v2455_v15, %v149_v36 }
 0x109   :  { %v157_v43 = vmul.f32 0.5, %v156_v40  ;;  %124 = vadd.xlane.f32.xlu2 %v123_v41  ;;  %v113_v44 = vpop.xlane.xlu2 %112  ;;  %v116_v45 = vpop.xlane.xlu0 %115  ;;  %v234_v46 = vmul.f32 %v153_v42, %v2750_v26 }
 0x10a   :  { %v130_v50 = vmul.f32 %v113_v44, %v2744_v20  ;;  %v131_v51 = vmul.f32 %v116_v45, %v2744_v20  ;;  %v2849_v52 = vpop.permute.xlu1 %254 }
 0x10b   :  { %v158_v53 = vsub.f32 1.5, %v157_v43  ;;  %v244_v54 = vmul.f32 %v2802_v59, %v234_v46 }
 0x10c   :  { %v2459_v57 = vpop.eup %2458  ;;  %v139_v58 = vadd.f32 1e-05, %v130_v50  ;;  %v140_v60 = vadd.f32 1e-05, %v131_v51 }
 0x10d   :  { %v159_v61 = vmul.f32 %v2457_v30, %v158_v53  ;;  %v175_v26 = vmul.f32 %v2459_v57, %v138_v33  ;;  %v257_v62 = vadd.f32 %v2849_v52, %v244_v54  ;;  %vm181_vm13 = vweird.f32 %v2459_v57 }
 0x10e   :  { %2460 = vrsqrt.f32 %v139_v58  ;;  %vm182_vm14 = vmor %vm180_vm12, %vm181_vm13  ;;  %vm190_vm15 = vweird.f32 %v139_v58  ;;  %vm200_vm4 = vweird.f32 %v140_v60 }
 0x10f   :  { %v176_v1 = vmul.f32 %v2459_v57, %v175_v26  ;;  %2462 = vrsqrt.f32 %v140_v60  ;;  %2184 = vmatmul.msk.f32.vlgmr.msra.gmra.mxu0 %vm36_vm0, %v257_v62  ;;  %v163_v2 = vsel %vm162_vm10, %v2457_v30, %v159_v61 }
 0x110   :  { %v235_v3 = vmul.f32 %v163_v2, %v2763_v37  ;;  %v236_v37 = vmul.f32 %v173_v8, %v2748_v25 }
 0x111   :  { %v177_v4 = vmul.f32 0.5, %v176_v1  ;;  %v119_v5 = vpop.xlane.xlu2 %118 }
 0x112   :  { %v132_v6 = vmul.f32 %v119_v5, %v2744_v20  ;;  %v245_v7 = vmul.f32 %v2802_v59, %v235_v3  ;;  %v246_v12 = vmul.f32 %v2802_v59, %v236_v37 }
 0x113   :  { %v178_v9 = vsub.f32 1.5, %v177_v4 }
 0x114   :  { %v2461_v10 = vpop.eup %2460  ;;  %v141_v11 = vadd.f32 1e-05, %v132_v6  ;;  %v258_v13 = vadd.f32 %v2849_v52, %v245_v7  ;;  %v259_v28 = vadd.f32 %v2849_v52, %v246_v12 }
 0x115   :  { %v2463_v15 = vpop.eup %2462  ;;  %v185_v16 = vmul.f32 %v2461_v10, %v139_v58  ;;  %v179_v17 = vmul.f32 %v2459_v57, %v178_v9  ;;  %vm191_vm1 = vweird.f32 %v2461_v10 }
 0x116   :  { %v195_v18 = vmul.f32 %v2463_v15, %v140_v60  ;;  %2464 = vrsqrt.f32 %v141_v11  ;;  %vm192_vm3 = vmor %vm190_vm15, %vm191_vm1  ;;  %vm201_vm5 = vweird.f32 %v2463_v15  ;;  %vm210_vm7 = vweird.f32 %v141_v11 }
 0x117   :  { %v186_v19 = vmul.f32 %v2461_v10, %v185_v16  ;;  %2185 = vmatmul.msk.f32.gmra.mxu0 %vm36_vm0, %v258_v13  ;;  %v183_v23 = vsel %vm182_vm14, %v2459_v57, %v179_v17  ;;  %vm202_vm6 = vmor %vm200_vm4, %vm201_vm5  ;;  %vm378_vm1 = vcmask 64512   ;;  %vm477_vm4 = vcmask 556032  }
 0x118   :  { %v196_v22 = vmul.f32 %v2463_v15, %v195_v18  ;;  %v237_v25 = vmul.f32 %v183_v23, %v2765_v38  ;;  %vm502_vm5 = vcmask 551936  }
 0x119   :  { %v187_v21 = vmul.f32 0.5, %v186_v19 }
 0x11a   :  { %v197_v30 = vmul.f32 0.5, %v196_v22  ;;  %v247_v33 = vmul.f32 %v2802_v59, %v237_v25 }
 0x11b   :  { %v188_v24 = vsub.f32 1.5, %v187_v21 }
 0x11c   :  { %v2465_v27 = vpop.eup %2464  ;;  %v198_v34 = vsub.f32 1.5, %v197_v30  ;;  %v260_v39 = vadd.f32 %v2849_v52, %v247_v33 }
 0x11d   :  { %v189_v29 = vmul.f32 %v2461_v10, %v188_v24  ;;  %v205_v31 = vmul.f32 %v2465_v27, %v141_v11  ;;  %vm211_vm8 = vweird.f32 %v2465_v27  ;;  %v270_v24 = vperm.slane %v2795_v55, 2 }
 0x11e   :  { %v199_v41 = vmul.f32 %v2463_v15, %v198_v34  ;;  %vm212_vm9 = vmor %vm210_vm7, %vm211_vm8  ;;  %vm1615_vm7 = vcmask 195584  }
 0x11f   :  { %2186 = vmatmul.msk.f32.gmra.mxu0 %vm36_vm0, %v259_v28  ;;  %v206_v35 = vmul.f32 %v2465_v27, %v205_v31  ;;  %v193_v36 = vsel %vm192_vm3, %v2461_v10, %v189_v29  ;;  %vm577_vm3 = vcmask 1043456  }
 0x120   :  { %v238_v40 = vmul.f32 %v193_v36, %v2780_v47  ;;  %v203_v44 = vsel %vm202_vm6, %v2463_v15, %v199_v41  ;;  %vm1605_vm6 = vcmask 130048  }
 0x121   :  { %v207_v42 = vmul.f32 0.5, %v206_v35  ;;  %v239_v46 = vmul.f32 %v203_v44, %v2782_v48 }
 0x122   :  { %v248_v38 = vmul.f32 %v2802_v59, %v238_v40 }
 0x123   :  { %v208_v43 = vsub.f32 1.5, %v207_v42  ;;  %v249_v47 = vmul.f32 %v2802_v59, %v239_v46 }
 0x124   :  { %v261_v45 = vadd.f32 %v2849_v52, %v248_v38 }
 0x125   :  { %v209_v49 = vmul.f32 %v2465_v27, %v208_v43  ;;  %v262_v51 = vadd.f32 %v2849_v52, %v249_v47 }
 0x127   :  { %2187 = vmatmul.msk.f32.gmra.mxu0 %vm36_vm0, %v260_v39  ;;  %v213_v50 = vsel %vm212_vm9, %v2465_v27, %v209_v49 }
 0x128   :  { %v240_v53 = vmul.f32 %v213_v50, %v2797_v56 }
 0x12a   :  { %v250_v54 = vmul.f32 %v2802_v59, %v240_v53 }
 0x12c   :  { %v263_v57 = vadd.f32 %v2849_v52, %v250_v54 }
 0x12f   :  { %2188 = vmatmul.msk.f32.gmra.mxu0 %vm36_vm0, %v261_v45 }
 0x137   :  { %2189 = vmatmul.msk.f32.gmra.mxu0 %vm36_vm0, %v262_v51 }
 0x13f   :  { %2190 = vmatmul.msk.f32.gmra.mxu0 %vm36_vm0, %v263_v57 }
 0x174   :  { %v122_v48 = vpop.xlane.xlu0 %121 }
 0x175   :  { %v133_v58 = vmul.f32 %v122_v48, %v2744_v20 }
 0x177   :  { %v142_v60 = vadd.f32 1e-05, %v133_v58 }
 0x179   :  { %2466 = vrsqrt.f32 %v142_v60  ;;  %vm220_vm11 = vweird.f32 %v142_v60 }
 0x17c   :  { %v125_v61 = vpop.xlane.xlu2 %124 }
 0x17d   :  { %v134_v26 = vmul.f32 %v125_v61, %v2744_v20 }
 0x17f   :  { %v143_v62 = vadd.f32 1e-05, %v134_v26  ;;  %v2467_v63 = vpop.eup %2466 }
 0x180   :  { %v215_v0 = vmul.f32 %v2467_v63, %v142_v60  ;;  %vm221_vm10 = vweird.f32 %v2467_v63 }
 0x181   :  { %2468 = vrsqrt.f32 %v143_v62  ;;  %vm222_vm12 = vmor %vm220_vm11, %vm221_vm10  ;;  %vm230_vm14 = vweird.f32 %v143_v62 }
 0x182   :  { %v216_v56 = vmul.f32 %v2467_v63, %v215_v0 }
 0x184   :  { %v217_v1 = vmul.f32 0.5, %v216_v56 }
 0x186   :  { %v218_v3 = vsub.f32 1.5, %v217_v1 }
 0x187   :  { %v2469_v2 = vpop.eup %2468 }
 0x188   :  { %v225_v4 = vmul.f32 %v2469_v2, %v143_v62  ;;  %v219_v5 = vmul.f32 %v2467_v63, %v218_v3  ;;  %vm231_vm13 = vweird.f32 %v2469_v2 }
 0x189   :  { %vm232_vm15 = vmor %vm230_vm14, %vm231_vm13 }
 0x18a   :  { %v226_v6 = vmul.f32 %v2469_v2, %v225_v4  ;;  %v223_v7 = vsel %vm222_vm12, %v2467_v63, %v219_v5 }
 0x18b   :  { %v241_v10 = vmul.f32 %v223_v7, %v2830_v14 }
 0x18c   :  { %v227_v8 = vmul.f32 0.5, %v226_v6  ;;  %v315_v9 = vpop.f32.mrf.mxu0 }
 0x18d   :  { %v251_v13 = vmul.f32 %v2802_v59, %v241_v10  ;;  %v2940_v35 = vadd.f32 %v315_v9, %v270_v24 }
 0x18e   :  { %v228_v11 = vsub.f32 1.5, %v227_v8 }
 0x18f   :  { %v264_v16 = vadd.f32 %v2849_v52, %v251_v13 }
 0x190   :  { %v229_v15 = vmul.f32 %v2469_v2, %v228_v11 }
 0x191   :  { %2191 = vmatmul.msk.f32.gmra.mxu0 %vm36_vm0, %v264_v16 }
 0x192   :  { %v233_v37 = vsel %vm232_vm15, %v2469_v2, %v229_v15 }
 0x193   :  { %v242_v17 = vmul.f32 %v233_v37, %v2841_v32 }
 0x194   :  { %v318_v18 = vpop.f32.mrf.mxu0 }
 0x195   :  { %v252_v19 = vmul.f32 %v2802_v59, %v242_v17  ;;  %v2912_v25 = vadd.f32 %v318_v18, %v270_v24 }
 0x197   :  { %v265_v21 = vadd.f32 %v2849_v52, %v252_v19  ;;  %v2980_v41 = vpack.i.bf16 %v2940_v35, %v2912_v25 }
 0x199   :  { %2192 = vmatmul.msk.f32.gmra.mxu0 %vm36_vm0, %v265_v21 }
 0x19c   :  { %v321_v14 = vpop.f32.mrf.mxu0 }
 0x19d   :  { %v2924_v33 = vadd.f32 %v321_v14, %v270_v24 }
 0x1a4   :  { %v324_v12 = vpop.f32.mrf.mxu0 }
 0x1a5   :  { %v2932_v34 = vadd.f32 %v324_v12, %v270_v24 }
 0x1a7   :  { %v2970_v40 = vpack.i.bf16 %v2924_v33, %v2932_v34 }
 0x1ac   :  { %v327_v22 = vpop.f32.mrf.mxu0 }
 0x1ad   :  { %v2908_v52 = vadd.f32 %v327_v22, %v270_v24 }
 0x1b4   :  { %v330_v23 = vpop.f32.mrf.mxu0 }
 0x1b5   :  { %v2904_v32 = vadd.f32 %v330_v23, %v270_v24 }
 0x1b7   :  { %v2960_v39 = vpack.i.bf16 %v2908_v52, %v2904_v32 }
 0x1bc   :  { %v333_v27 = vpop.f32.mrf.mxu0 }
 0x1bd   :  { %v2900_v28 = vadd.f32 %v333_v27, %v270_v24 }
 0x1bf   :  { %372 = vrot.lane.b32.xlu1 %v2900_v28, %s2661_s21 }
 0x1c7   :  { %370 = vrot.lane.b32.xlu1 %v2904_v32, %s2661_s21 }
 0x1cf   :  { %368 = vrot.lane.b32.xlu1 %v2908_v52, %s2661_s21 }
 0x1d7   :  { %362 = vrot.lane.b32.xlu1 %v2912_v25, %s2661_s21 }
 0x20e   :  { %v336_v55 = vpop.f32.mrf.mxu0 }
 0x20f   :  { %v2916_v29 = vadd.f32 %v336_v55, %v270_v24 }
 0x211   :  { %666 = vrot.lane.b32.xlu1 %v2916_v29, %s2662_s2  ;;  %374 = vrot.lane.b32.xlu2 %v2916_v29, %s2661_s21  ;;  %v2944_v36 = vpack.i.bf16 %v2900_v28, %v2916_v29 }
 0x216   :  { %v339_v30 = vpop.f32.mrf.mxu0 }
 0x217   :  { %v2922_v31 = vadd.f32 %v339_v30, %v270_v24 }
 0x219   :  { %376 = vrot.lane.b32.xlu0 %v2922_v31, %s2661_s21  ;;  %660 = vrot.lane.b32.xlu1 %v2908_v52, %s2662_s2 }
 0x21a   :  { %364 = vrot.lane.b32.xlu2 %v2924_v33, %s2661_s21 }
 0x221   :  { %366 = vrot.lane.b32.xlu0 %v2932_v34, %s2661_s21  ;;  %658 = vrot.lane.b32.xlu1 %v2932_v34, %s2662_s2 }
 0x222   :  { %662 = vrot.lane.b32.xlu2 %v2904_v32, %s2662_s2 }
 0x229   :  { %360 = vrot.lane.b32.xlu0 %v2940_v35, %s2661_s21  ;;  %656 = vrot.lane.b32.xlu1 %v2924_v33, %s2662_s2 }
 0x22a   :  { %2371 = vrot.lane.b32.xlu2 %v2944_v36, %s2663_s30 }
 0x231   :  { %664 = vrot.lane.b32.xlu0 %v2900_v28, %s2662_s2  ;;  %654 = vrot.lane.b32.xlu1 %v2912_v25, %s2662_s2  ;;  %v373_v45 = vpop.permute.xlu1 %372 }
 0x232   :  { %636 = vrot.lane.b32.xlu2 %v2912_v25, %s2664_s8 }
 0x239   :  { %2376 = vrot.lane.b32.xlu0 %v2960_v39, %s2663_s30  ;;  %644 = vrot.lane.b32.xlu1 %v2904_v32, %s2664_s8  ;;  %v371_v47 = vpop.permute.xlu1 %370 }
 0x23a   :  { %638 = vrot.lane.b32.xlu2 %v2924_v33, %s2664_s8 }
 0x241   :  { %2381 = vrot.lane.b32.xlu0 %v2970_v40, %s2663_s30  ;;  %646 = vrot.lane.b32.xlu1 %v2900_v28, %s2664_s8  ;;  %v369_v53 = vpop.permute.xlu1 %368 }
 0x242   :  { %640 = vrot.lane.b32.xlu2 %v2932_v34, %s2664_s8 }
 0x249   :  { %2386 = vrot.lane.b32.xlu0 %v2980_v41, %s2663_s30  ;;  %1238 = vrot.lane.b32.xlu1 %v2904_v32, %s2665_s9  ;;  %v363_v60 = vpop.permute.xlu1 %362 }
 0x24a   :  { %954 = vrot.lane.b32.xlu2 %v2916_v29, %s2666_s10 }
 0x251   :  { %652 = vrot.lane.b32.xlu0 %v2940_v35, %s2662_s2  ;;  %942 = vrot.lane.b32.xlu1 %v2912_v25, %s2666_s10 }
 0x252   :  { %952 = vrot.lane.b32.xlu2 %v2900_v28, %s2666_s10 }
 0x259   :  { %634 = vrot.lane.b32.xlu0 %v2940_v35, %s2664_s8 }
 0x25a   :  { %1240 = vrot.lane.b32.xlu2 %v2900_v28, %s2665_s9 }
 0x261   :  { %642 = vrot.lane.b32.xlu0 %v2908_v52, %s2664_s8 }
 0x262   :  { %950 = vrot.lane.b32.xlu2 %v2904_v32, %s2666_s10 }
 0x269   :  { %1242 = vrot.lane.b32.xlu0 %v2916_v29, %s2665_s9 }
 0x26a   :  { %948 = vrot.lane.b32.xlu2 %v2908_v52, %s2666_s10 }
 0x26b   :  { %v375_v42 = vpop.permute.xlu2 %374 }
 0x271   :  { %946 = vrot.lane.b32.xlu0 %v2932_v34, %s2666_s10 }
 0x272   :  { %1236 = vrot.lane.b32.xlu2 %v2908_v52, %s2665_s9 }
 0x274   :  { %v365_v38 = vpop.permute.xlu2 %364 }
 0x279   :  { %540 = vrot.lane.b32.xlu0 %v2922_v31, %s2663_s30 }
 0x27a   :  { %648 = vrot.lane.b32.xlu2 %v2916_v29, %s2664_s8 }
 0x27c   :  { %v663_v43 = vpop.permute.xlu2 %662 }
 0x281   :  { %1232 = vrot.lane.b32.xlu0 %v2924_v33, %s2665_s9 }
 0x282   :  { %668 = vrot.lane.b32.xlu2 %v2922_v31, %s2662_s2  ;;  %s2669_s2 = smov 56  }
 0x283   :  { %v667_v1 = vpop.permute.xlu1 %666 }
 0x284   :  { %v3018_v44 = vpop.permute.xlu2 %2371 }
 0x285   :  { %v2373_v17 = vunpack.i.l.bf16 %v3018_v44  ;;  %v2374_v18 = vunpack.i.h.bf16 %v3018_v44 }
 0x289   :  { %1230 = vrot.lane.b32.xlu0 %v2912_v25, %s2665_s9 }
 0x28a   :  { %956 = vrot.lane.b32.xlu2 %v2922_v31, %s2666_s10 }
 0x28b   :  { %v377_v46 = vpop.permute.xlu0 %376  ;;  %v661_v6 = vpop.permute.xlu1 %660 }
 0x28c   :  { %v3024_v49 = vpop.permute.xlu2 %636  ;;  %2193 = vmatpush.xpose.msk.msra.mxu1 %vm378_vm1, %v377_v46  ;;  %v343_v46 = vld [vmem:[%s4027_s4 + $0x8] sm:$0xff] }
 0x290   :  { %2194 = vmatpush.xpose.msk.msra.mxu1 %vm378_vm1, %v375_v42 }
 0x291   :  { %1228 = vrot.lane.b32.xlu0 %v2940_v35, %s2665_s9 }
 0x292   :  { %1244 = vrot.lane.b32.xlu2 %v2922_v31, %s2665_s9 }
 0x293   :  { %v367_v50 = vpop.permute.xlu0 %366  ;;  %v659_v9 = vpop.permute.xlu1 %658 }
 0x294   :  { %v3032_v51 = vpop.permute.xlu2 %638  ;;  %2195 = vmatpush.xpose.msk.msra.mxu1 %vm378_vm1, %v373_v45 }
 0x298   :  { %2196 = vmatpush.xpose.msk.msra.mxu1 %vm378_vm1, %v371_v47 }
 0x29b   :  { %v361_v54 = vpop.permute.xlu0 %360  ;;  %v657_v13 = vpop.permute.xlu1 %656 }
 0x29c   :  { %v3036_v57 = vpop.permute.xlu2 %640  ;;  %2197 = vmatpush.xpose.msk.msra.mxu1 %vm378_vm1, %v369_v53 }
 0x2a0   :  { %2198 = vmatpush.xpose.msk.msra.mxu1 %vm378_vm1, %v367_v50 }
 0x2a3   :  { %v665_v48 = vpop.permute.xlu0 %664  ;;  %v655_v16 = vpop.permute.xlu1 %654 }
 0x2a4   :  { %v3040_v58 = vpop.permute.xlu2 %954  ;;  %2199 = vmatpush.xpose.msk.msra.mxu1 %vm378_vm1, %v365_v38  ;;  %v342_v38 = vld [vmem:[%s4027_s4] sm:$0xff] }
 0x2a8   :  { %2200 = vmatpush.xpose.msk.msra.mxu1 %vm378_vm1, %v363_v60 }
 0x2ab   :  { %v2377_v61 = vpop.permute.xlu0 %2376  ;;  %v645_v22 = vpop.permute.xlu1 %644 }
 0x2ac   :  { %v3044_v26 = vpop.permute.xlu2 %952  ;;  %2201 = vmatpush.xpose.msk.msra.mxu1 %vm378_vm1, %v361_v54  ;;  %v2378_v19 = vunpack.i.l.bf16 %v2377_v61  ;;  %v2379_v21 = vunpack.i.h.bf16 %v2377_v61  ;;  %v344_v54 = vld [vmem:[%s4027_s4 + $0x10] sm:$0xff] }
 0x2af   :  { %2202 = vmatmul.msk.f32.vlgmr.msra.gmra.mxu1 %vm378_vm1, %v2940_v35 }
 0x2b3   :  { %v2382_v62 = vpop.permute.xlu0 %2381  ;;  %v647_v30 = vpop.permute.xlu1 %646 }
 0x2b4   :  { %v3049_v63 = vpop.permute.xlu2 %1240  ;;  %v2383_v12 = vunpack.i.l.bf16 %v2382_v62  ;;  %v2384_v23 = vunpack.i.h.bf16 %v2382_v62 }
 0x2b7   :  { %2203 = vmatmul.msk.f32.gmra.mxu1 %vm378_vm1, %v2912_v25 }
 0x2bb   :  { %v2387_v0 = vpop.permute.xlu0 %2386  ;;  %v1239_v42 = vpop.permute.xlu1 %1238 }
 0x2bc   :  { %v3053_v56 = vpop.permute.xlu2 %950  ;;  %v2388_v24 = vunpack.i.l.bf16 %v2387_v0  ;;  %v2389_v27 = vunpack.i.h.bf16 %v2387_v0 }
 0x2bf   :  { %2204 = vmatmul.msk.f32.gmra.mxu1 %vm378_vm1, %v2924_v33 }
 0x2c3   :  { %v653_v2 = vpop.permute.xlu0 %652 }
 0x2c4   :  { %v949_v3 = vpop.permute.xlu2 %948 }
 0x2c7   :  { %2205 = vmatmul.msk.f32.gmra.mxu1 %vm378_vm1, %v2932_v34 }
 0x2cb   :  { %v635_v4 = vpop.permute.xlu0 %634 }
 0x2cc   :  { %v1237_v5 = vpop.permute.xlu2 %1236 }
 0x2cf   :  { %2206 = vmatmul.msk.f32.gmra.mxu1 %vm378_vm1, %v2908_v52 }
 0x2d3   :  { %v643_v7 = vpop.permute.xlu0 %642 }
 0x2d4   :  { %v3061_v8 = vpop.permute.xlu2 %648 }
 0x2d7   :  { %2207 = vmatmul.msk.f32.gmra.mxu1 %vm378_vm1, %v2904_v32 }
 0x2db   :  { %v1243_v10 = vpop.permute.xlu0 %1242 }
 0x2dc   :  { %v669_v11 = vpop.permute.xlu2 %668 }
 0x2dd   :  { %2230 = vmatpush.xpose.msk.msra.mxu3 %vm378_vm1, %v669_v11  ;;  %v347_v11 = vld [vmem:[%s4027_s4 + $0x28] sm:$0xff] }
 0x2df   :  { %2208 = vmatmul.msk.f32.gmra.mxu1 %vm378_vm1, %v2900_v28 }
 0x2e1   :  { %2231 = vmatpush.xpose.msk.msra.mxu3 %vm378_vm1, %v667_v1 }
 0x2e3   :  { %v947_v15 = vpop.permute.xlu0 %946 }
 0x2e4   :  { %v957_v14 = vpop.permute.xlu2 %956 }
 0x2e5   :  { %2232 = vmatpush.xpose.msk.msra.mxu3 %vm378_vm1, %v665_v48 }
 0x2e7   :  { %2209 = vmatmul.msk.f32.gmra.mxu1 %vm378_vm1, %v2916_v29 }
 0x2e9   :  { %2233 = vmatpush.xpose.msk.msra.mxu3 %vm378_vm1, %v663_v43 }
 0x2eb   :  { %v541_v37 = vpop.permute.xlu0 %540 }
 0x2ec   :  { %2211 = vmatpush.msk.msra.mxu2 %vm577_vm3, %v541_v37  ;;  %v1245_v55 = vpop.permute.xlu2 %1244 }
 0x2ed   :  { %2234 = vmatpush.xpose.msk.msra.mxu3 %vm378_vm1, %v661_v6 }
 0x2ee   :  { %588 = vmatpush.msra.mxu2 %v2373_v17 }
 0x2ef   :  { %2210 = vmatmul.msk.f32.gmra.mxu1 %vm378_vm1, %v2922_v31 }
 0x2f0   :  { %589 = vmatpush.msra.mxu2 %v2374_v18  ;;  %v348_v18 = vld [vmem:[%s4027_s4 + $0x30] sm:$0xff] }
 0x2f1   :  { %2235 = vmatpush.xpose.msk.msra.mxu3 %vm378_vm1, %v659_v9 }
 0x2f2   :  { %590 = vmatpush.msra.mxu2 %v2378_v19 }
 0x2f4   :  { %591 = vmatpush.msra.mxu2 %v2379_v21 }
 0x2f5   :  { %2236 = vmatpush.xpose.msk.msra.mxu3 %vm378_vm1, %v657_v13 }
 0x2f6   :  { %592 = vmatpush.msra.mxu2 %v2383_v12 }
 0x2f8   :  { %593 = vmatpush.msra.mxu2 %v2384_v23 }
 0x2f9   :  { %2237 = vmatpush.xpose.msk.msra.mxu3 %vm378_vm1, %v655_v16 }
 0x2fa   :  { %594 = vmatpush.msra.mxu2 %v2388_v24 }
 0x2fc   :  { %595 = vmatpush.msra.mxu2 %v2389_v27 }
 0x2fd   :  { %2238 = vmatpush.xpose.msk.msra.mxu3 %vm378_vm1, %v653_v2  ;;  %v345_v2 = vld [vmem:[%s4027_s4 + $0x18] sm:$0xff] }
 0x2fe   :  { %2267 = vmatpush.xpose.msk.msrb.mxu2 %vm378_vm1, %v957_v14 }
 0x300   :  { %2239 = vmatmul.msk.f32.vlgmr.msra.gmra.mxu3 %vm378_vm1, %v635_v4  ;;  %v349_v4 = vld [vmem:[%s4027_s4 + $0x38] sm:$0xff] }
 0x301   :  { %2304 = vmatpush.xpose.msk.msrb.mxu3 %vm378_vm1, %v1245_v55 }
 0x302   :  { %2268 = vmatpush.xpose.msk.msrb.mxu2 %vm378_vm1, %v3040_v58 }
 0x305   :  { %2305 = vmatpush.xpose.msk.msrb.mxu3 %vm378_vm1, %v1243_v10 }
 0x306   :  { %2269 = vmatpush.xpose.msk.msrb.mxu2 %vm378_vm1, %v3044_v26 }
 0x308   :  { %2240 = vmatmul.msk.f32.gmra.mxu3 %vm378_vm1, %v3024_v49 }
 0x309   :  { %2306 = vmatpush.xpose.msk.msrb.mxu3 %vm378_vm1, %v3049_v63 }
 0x30a   :  { %2270 = vmatpush.xpose.msk.msrb.mxu2 %vm378_vm1, %v3053_v56 }
 0x30d   :  { %2307 = vmatpush.xpose.msk.msrb.mxu3 %vm378_vm1, %v1239_v42  ;;  %v1233_v42 = vpop.permute.xlu0 %1232 }
 0x30e   :  { %2271 = vmatpush.xpose.msk.msrb.mxu2 %vm378_vm1, %v949_v3 }
 0x310   :  { %2241 = vmatmul.msk.f32.gmra.mxu3 %vm378_vm1, %v3032_v51 }
 0x311   :  { %2308 = vmatpush.xpose.msk.msrb.mxu3 %vm378_vm1, %v1237_v5 }
 0x312   :  { %2272 = vmatpush.xpose.msk.msrb.mxu2 %vm378_vm1, %v947_v15 }
 0x318   :  { %2242 = vmatmul.msk.f32.gmra.mxu3 %vm378_vm1, %v3036_v57 }
 0x320   :  { %2243 = vmatmul.msk.f32.gmra.mxu3 %vm378_vm1, %v643_v7 }
 0x328   :  { %2244 = vmatmul.msk.f32.gmra.mxu3 %vm378_vm1, %v645_v22 }
 0x32c   :  { %v432_v43 = vpop.f32.mrf.mxu1 }
 0x32d   :  { %v433_v44 = vadd.f32 %v432_v43, %v342_v38  ;;  %v1231_v43 = vpop.permute.xlu0 %1230 }
 0x32f   :  { %v459_v45 = vmul.f32 1.442695, %v433_v44 }
 0x330   :  { %2245 = vmatmul.msk.f32.gmra.mxu3 %vm378_vm1, %v647_v30 }
 0x331   :  { %2470 = vpow2.f32 %v459_v45 }
 0x334   :  { %v435_v49 = vpop.f32.mrf.mxu1 }
 0x335   :  { %v436_v47 = vadd.f32 %v435_v49, %v343_v46  ;;  %v1229_v49 = vpop.permute.xlu0 %1228 }
 0x337   :  { %v3114_v50 = vpop.eup %2470  ;;  %v461_v51 = vmul.f32 1.442695, %v436_v47 }
 0x338   :  { %2246 = vmatmul.msk.f32.gmra.mxu3 %vm378_vm1, %v3061_v8  ;;  %v478_v53 = vsel %vm477_vm4, %v3114_v50, 0.0  ;;  %v346_v8 = vld [vmem:[%s4027_s4 + $0x20] sm:$0xff] }
 0x339   :  { %2472 = vpow2.f32 %v461_v51  ;;  %479 = vadd.xlane.f32.xlu2 %v478_v53 }
 0x33c   :  { %v438_v57 = vpop.f32.mrf.mxu1 }
 0x33d   :  { %v439_v48 = vadd.f32 %v438_v57, %v344_v54 }
 0x33f   :  { %v3123_v58 = vpop.eup %2472  ;;  %v463_v60 = vmul.f32 1.442695, %v439_v48 }
 0x340   :  { %v481_v61 = vsel %vm477_vm4, %v3123_v58, 0.0 }
 0x341   :  { %2474 = vpow2.f32 %v463_v60  ;;  %482 = vadd.xlane.f32.xlu1 %v481_v61 }
 0x344   :  { %v441_v63 = vpop.f32.mrf.mxu1 }
 0x345   :  { %v442_v3 = vadd.f32 %v441_v63, %v345_v2 }
 0x347   :  { %v3127_v26 = vpop.eup %2474  ;;  %v465_v7 = vmul.f32 1.442695, %v442_v3 }
 0x348   :  { %v484_v62 = vsel %vm477_vm4, %v3127_v26, 0.0 }
 0x349   :  { %485 = vadd.xlane.f32.xlu0 %v484_v62  ;;  %2476 = vpow2.f32 %v465_v7 }
 0x34c   :  { %v444_v0 = vpop.f32.mrf.mxu1 }
 0x34d   :  { %v445_v10 = vadd.f32 %v444_v0, %v346_v8  ;;  %v2222_v8 = vld [vmem:[%s4027_s4 + $0x50] sm:$0xff] }
 0x34f   :  { %v3159_v13 = vpop.eup %2476 }
 0x351   :  { %1234 = vrot.lane.b32.xlu2 %v2932_v34, %s2665_s9 }
 0x354   :  { %v447_v56 = vpop.f32.mrf.mxu1 }
 0x355   :  { %v448_v15 = vadd.f32 %v447_v56, %v347_v11 }
 0x357   :  { %v469_v37 = vmul.f32 1.442695, %v448_v15 }
 0x359   :  { %944 = vrot.lane.b32.xlu2 %v2924_v33, %s2666_s10 }
 0x35a   :  { %1212 = vrot.lane.b32.xlu1 %v2912_v25, %s2667_s17 }
 0x35c   :  { %v450_v1 = vpop.f32.mrf.mxu1 }
 0x35d   :  { %1210 = vrot.lane.b32.xlu0 %v2940_v35, %s2667_s17  ;;  %v451_v21 = vadd.f32 %v450_v1, %v348_v18 }
 0x35f   :  { %v471_v12 = vmul.f32 1.442695, %v451_v21 }
 0x361   :  { %650 = vrot.lane.b32.xlu2 %v2922_v31, %s2664_s8 }
 0x364   :  { %v453_v5 = vpop.f32.mrf.mxu1 }
 0x365   :  { %v454_v6 = vadd.f32 %v453_v5, %v349_v4 }
 0x367   :  { %v473_v9 = vmul.f32 1.442695, %v454_v6 }
 0x369   :  { %940 = vrot.lane.b32.xlu2 %v2940_v35, %s2666_s10  ;;  %2478 = vpow2.f32 %v473_v9 }
 0x36f   :  { %v3163_v16 = vpop.eup %2478 }
 0x370   :  { %v499_v17 = vsel %vm477_vm4, %v3163_v16, 0.0 }
 0x371   :  { %922 = vrot.lane.b32.xlu2 %v2940_v35, %s2668_s20  ;;  %v467_v35 = vmul.f32 1.442695, %v445_v10  ;;  %v350_v10 = vld [vmem:[%s4027_s4 + $0x40] sm:$0xf] }
 0x373   :  { %2480 = vpow2.f32 %v467_v35  ;;  %v456_v35 = vpop.f32.mrf.mxu1 }
 0x374   :  { %2482 = vpow2.f32 %v469_v37 }
 0x375   :  { %2484 = vpow2.f32 %v471_v12 }
 0x379   :  { %924 = vrot.lane.b32.xlu2 %v2912_v25, %s2668_s20  ;;  %v487_v25 = vsel %vm477_vm4, %v3159_v13, 0.0  ;;  %v3172_v19 = vpop.eup %2480 }
 0x37a   :  { %v490_v14 = vsel %vm477_vm4, %v3172_v19, 0.0  ;;  %v3178_v22 = vpop.eup %2482 }
 0x37b   :  { %v493_v24 = vsel %vm477_vm4, %v3178_v22, 0.0  ;;  %v3186_v27 = vpop.eup %2484 }
 0x37c   :  { %v496_v30 = vsel %vm477_vm4, %v3186_v27, 0.0 }
 0x381   :  { %1214 = vrot.lane.b32.xlu2 %v2924_v33, %s2667_s17 }
 0x383   :  { %v3180_v23 = vpop.f32.mrf.mxu3 }
 0x384   :  { %488 = vadd.xlane.f32.xlu1 %v487_v25  ;;  %v457_v25 = vadd.f32 %v456_v35, %v350_v10 }
 0x386   :  { %v475_v18 = vmul.f32 1.442695, %v457_v25 }
 0x387   :  { %500 = vadd.xlane.f32.xlu0 %v499_v17  ;;  %v2226_v17 = vld [vmem:[%s4027_s4 + $0x70] sm:$0xff] }
 0x389   :  { %930 = vrot.lane.b32.xlu2 %v2908_v52, %s2668_s20 }
 0x38b   :  { %v3190_v55 = vpop.f32.mrf.mxu3 }
 0x38c   :  { %491 = vadd.xlane.f32.xlu1 %v490_v14  ;;  %v727_v11 = vadd.f32 %v2222_v8, %v3190_v55 }
 0x38e   :  { %v752_v37 = vmul.f32 1.442695, %v727_v11 }
 0x391   :  { %1220 = vrot.lane.b32.xlu2 %v2904_v32, %s2667_s17 }
 0x393   :  { %v729_v38 = vpop.f32.mrf.mxu3 }
 0x394   :  { %494 = vadd.xlane.f32.xlu1 %v493_v24 }
 0x399   :  { %936 = vrot.lane.b32.xlu2 %v2916_v29, %s2668_s20 }
 0x39b   :  { %926 = vrot.lane.b32.xlu0 %v2924_v33, %s2668_s20  ;;  %v943_v33 = vpop.permute.xlu1 %942  ;;  %v3204_v45 = vpop.f32.mrf.mxu3 }
 0x39c   :  { %497 = vadd.xlane.f32.xlu1 %v496_v30 }
 0x3a1   :  { %1226 = vrot.lane.b32.xlu2 %v2922_v31, %s2667_s17 }
 0x3a3   :  { %1216 = vrot.lane.b32.xlu0 %v2932_v34, %s2667_s17 }
 0x3a9   :  { %2396 = vrot.lane.b32.xlu2 %v2960_v39, %s2669_s2 }
 0x3ab   :  { %932 = vrot.lane.b32.xlu0 %v2904_v32, %s2668_s20  ;;  %v3215_v32 = vpop.f32.mrf.mxu3 }
 0x3ac   :  { %v480_v44 = vpop.xlane.xlu2 %479 }
 0x3ad   :  { %2486 = vrcp.f32 %v480_v44 }
 0x3b1   :  { %2406 = vrot.lane.b32.xlu2 %v2980_v41, %s2669_s2 }
 0x3b3   :  { %v2487_v46 = vpop.eup %2486  ;;  %1222 = vrot.lane.b32.xlu0 %v2900_v28, %s2667_s17  ;;  %v738_v60 = vpop.f32.mrf.mxu3 }
 0x3b4   :  { %v483_v47 = vpop.xlane.xlu1 %482  ;;  %v1235_v51 = vpop.permute.xlu2 %1234  ;;  %v515_v53 = vmul.f32 %v2487_v46, %v3114_v50  ;;  %v739_v21 = vadd.f32 %v2226_v17, %v738_v60  ;;  %v2229_v17 = vld [vmem:[%s4027_s4 + $0x88] sm:$0xf] }
 0x3b5   :  { %2488 = vrcp.f32 %v483_v47  ;;  %928 = vrot.lane.b32.xlu1 %v2932_v34, %s2668_s20  ;;  %2309 = vmatpush.xpose.msk.msrb.mxu3 %vm378_vm1, %v1235_v51 }
 0x3b6   :  { %2212 = vmatmul.msk.f32.vlgmr.msra.gmra.mxu2 %vm477_vm4, %v515_v53  ;;  %v760_v14 = vmul.f32 1.442695, %v739_v21 }
 0x3b9   :  { %2310 = vmatpush.xpose.msk.msrb.mxu3 %vm378_vm1, %v1233_v42 }
 0x3bb   :  { %v2489_v54 = vpop.eup %2488  ;;  %938 = vrot.lane.b32.xlu0 %v2922_v31, %s2668_s20  ;;  %v741_v56 = vpop.f32.mrf.mxu3 }
 0x3bc   :  { %v486_v57 = vpop.xlane.xlu0 %485  ;;  %v945_v48 = vpop.permute.xlu2 %944  ;;  %v516_v50 = vmul.f32 %v2489_v54, %v3123_v58 }
 0x3bd   :  { %2490 = vrcp.f32 %v486_v57  ;;  %1218 = vrot.lane.b32.xlu1 %v2908_v52, %s2667_s17  ;;  %2273 = vmatpush.xpose.msk.msrb.mxu2 %vm378_vm1, %v945_v48  ;;  %v2223_v52 = vld [vmem:[%s4027_s4 + $0x58] sm:$0xff] }
 0x3be   :  { %2311 = vmatpush.xpose.msk.msrb.mxu3 %vm378_vm1, %v1231_v43  ;;  %2213 = vmatmul.msk.f32.gmra.mxu2 %vm477_vm4, %v516_v50  ;;  %v730_v62 = vadd.f32 %v2223_v52, %v729_v38 }
 0x3c0   :  { %v754_v63 = vmul.f32 1.442695, %v730_v62 }
 0x3c1   :  { %2274 = vmatpush.xpose.msk.msrb.mxu2 %vm378_vm1, %v943_v33 }
 0x3c2   :  { %2312 = vmatpush.xpose.msk.msrb.mxu3 %vm378_vm1, %v1229_v49  ;;  %2492 = vpow2.f32 %v754_v63 }
 0x3c3   :  { %v2491_v34 = vpop.eup %2490  ;;  %2391 = vrot.lane.b32.xlu0 %v2944_v36, %s2669_s2  ;;  %v744_v8 = vpop.f32.mrf.mxu3 }
 0x3c4   :  { %v651_v58 = vpop.permute.xlu2 %650  ;;  %v517_v61 = vmul.f32 %v2491_v34, %v3127_v26  ;;  %v2227_v26 = vld [vmem:[%s4027_s4 + $0x78] sm:$0xff] }
 0x3c5   :  { %934 = vrot.lane.b32.xlu1 %v2900_v28, %s2668_s20  ;;  %2247 = vmatmul.msk.f32.gmra.mxu3 %vm378_vm1, %v651_v58  ;;  %v742_v1 = vadd.f32 %v2227_v26, %v741_v56  ;;  %v2225_v56 = vld [vmem:[%s4027_s4 + $0x68] sm:$0xff] }
 0x3c6   :  { %2214 = vmatmul.msk.f32.gmra.mxu2 %vm477_vm4, %v517_v61 }
 0x3c7   :  { %v762_v2 = vmul.f32 1.442695, %v742_v1  ;;  %v736_v1 = vadd.f32 %v2225_v56, %v3215_v32 }
 0x3c8   :  { %v3249_v4 = vpop.eup %2492 }
 0x3c9   :  { %2494 = vpow2.f32 %v762_v2  ;;  %v774_v6 = vsel %vm477_vm4, %v3249_v4, 0.0 }
 0x3ca   :  { %2496 = vpow2.f32 %v752_v37 }
 0x3cb   :  { %2401 = vrot.lane.b32.xlu0 %v2970_v40, %s2669_s2  ;;  %2498 = vpow2.f32 %v475_v18 }
 0x3cc   :  { %v941_v0 = vpop.permute.xlu2 %940  ;;  %v1213_v5 = vpop.permute.xlu1 %1212  ;;  %2500 = vpow2.f32 %v760_v14 }
 0x3cd   :  { %1224 = vrot.lane.b32.xlu1 %v2916_v29, %s2667_s17  ;;  %2275 = vmatpush.xpose.msk.msrb.mxu2 %vm378_vm1, %v941_v0 }
 0x3cf   :  { %v1211_v28 = vpop.permute.xlu0 %1210  ;;  %v3256_v7 = vpop.eup %2494 }
 0x3d0   :  { %2313 = vmatmul.msk.f32.vlgmr.msrb.gmra.mxu3 %vm378_vm1, %v1211_v28  ;;  %v786_v9 = vsel %vm477_vm4, %v3256_v7, 0.0  ;;  %v3271_v12 = vpop.eup %2496 }
 0x3d1   :  { %v3273_v24 = vpop.eup %2498  ;;  %v771_v55 = vsel %vm477_vm4, %v3271_v12, 0.0 }
 0x3d2   :  { %v503_v30 = vsel %vm502_vm5, %v3273_v24, 0.0  ;;  %v3279_v38 = vpop.eup %2500 }
 0x3d3   :  { %v783_v43 = vsel %vm477_vm4, %v3279_v38, 0.0 }
 0x3d4   :  { %v3247_v3 = vpop.permute.xlu2 %922 }
 0x3d8   :  { %2314 = vmatmul.msk.f32.gmra.mxu3 %vm378_vm1, %v1213_v5  ;;  %v758_v5 = vmul.f32 1.442695, %v736_v1 }
 0x3da   :  { %775 = vadd.xlane.f32.xlu2 %v774_v6  ;;  %v2228_v6 = vld [vmem:[%s4027_s4 + $0x80] sm:$0xff] }
 0x3db   :  { %v745_v32 = vadd.f32 %v2228_v6, %v744_v8 }
 0x3dc   :  { %v3254_v29 = vpop.permute.xlu2 %924 }
 0x3e2   :  { %787 = vadd.xlane.f32.xlu2 %v786_v9 }
 0x3e4   :  { %v1215_v15 = vpop.permute.xlu2 %1214 }
 0x3e5   :  { %2315 = vmatmul.msk.f32.gmra.mxu3 %vm378_vm1, %v1215_v15  ;;  %v764_v15 = vmul.f32 1.442695, %v745_v32 }
 0x3f5   :  { %772 = vadd.xlane.f32.xlu0 %v771_v55 }
 0x3f7   :  { %504 = vadd.xlane.f32.xlu1 %v503_v30  ;;  %v489_v42 = vpop.xlane.xlu1 %488 }
 0x3f8   :  { %2502 = vrcp.f32 %v489_v42 }
 0x3fa   :  { %1117 = vrot.lane.b32.xlu2 %v2922_v31, %s2670_s18  ;;  %v501_v49 = vpop.xlane.xlu0 %500 }
 0x3fd   :  { %784 = vadd.xlane.f32.xlu0 %v783_v43 }
 0x3fe   :  { %v2503_v33 = vpop.eup %2502 }
 0x3ff   :  { %v492_v44 = vpop.xlane.xlu1 %491  ;;  %v518_v46 = vmul.f32 %v2503_v33, %v3159_v13 }
 0x400   :  { %2504 = vrcp.f32 %v492_v44  ;;  %v2295_v44 = vld [vmem:[%s4027_s4 + $0xd8] sm:$0xff] }
 0x401   :  { %2215 = vmatmul.msk.f32.gmra.mxu2 %vm477_vm4, %v518_v46 }
 0x402   :  { %2416 = vrot.lane.b32.xlu2 %v2944_v36, %s2671_s19 }
 0x406   :  { %v2505_v47 = vpop.eup %2504 }
 0x407   :  { %v495_v51 = vpop.xlane.xlu1 %494  ;;  %v519_v53 = vmul.f32 %v2505_v47, %v3172_v19  ;;  %v3303_v19 = vpop.permute.xlu2 %930 }
 0x408   :  { %2506 = vrcp.f32 %v495_v51 }
 0x409   :  { %2216 = vmatmul.msk.f32.gmra.mxu2 %vm477_vm4, %v519_v53 }
 0x40a   :  { %2426 = vrot.lane.b32.xlu2 %v2960_v39, %s2671_s19 }
 0x40d   :  { %v3293_v54 = vpop.permute.xlu0 %926 }
 0x40e   :  { %v2507_v13 = vpop.eup %2506 }
 0x40f   :  { %v498_v57 = vpop.xlane.xlu1 %497  ;;  %v520_v48 = vmul.f32 %v2507_v13, %v3178_v22  ;;  %v1221_v60 = vpop.permute.xlu2 %1220 }
 0x410   :  { %2508 = vrcp.f32 %v498_v57  ;;  %829 = vrot.lane.b32.xlu1 %v2922_v31, %s2669_s2 }
 0x411   :  { %2411 = vrot.lane.b32.xlu0 %v2944_v36, %s2670_s18  ;;  %2217 = vmatmul.msk.f32.gmra.mxu2 %vm477_vm4, %v520_v48  ;;  %2510 = vrcp.f32 %v501_v49  ;;  %v2296_v48 = vld [vmem:[%s4027_s4 + $0xe0] sm:$0xff] }
 0x412   :  { %2431 = vrot.lane.b32.xlu2 %v2970_v40, %s2670_s18 }
 0x415   :  { %v1217_v50 = vpop.permute.xlu0 %1216 }
 0x416   :  { %v2509_v34 = vpop.eup %2508  ;;  %2316 = vmatmul.msk.f32.gmra.mxu3 %vm378_vm1, %v1217_v50 }
 0x417   :  { %v521_v22 = vmul.f32 %v2509_v34, %v3186_v27  ;;  %v2511_v36 = vpop.eup %2510  ;;  %v2221_v27 = vld [vmem:[%s4027_s4 + $0x48] sm:$0xff]  ;;  %v3319_v61 = vpop.permute.xlu2 %936 }
 0x418   :  { %v522_v58 = vmul.f32 %v2511_v36, %v3163_v16  ;;  %v724_v52 = vadd.f32 %v2221_v27, %v3180_v23  ;;  %v2224_v16 = vld [vmem:[%s4027_s4 + $0x60] sm:$0xff] }
 0x419   :  { %2421 = vrot.lane.b32.xlu0 %v2960_v39, %s2670_s18  ;;  %2218 = vmatmul.msk.f32.gmra.mxu2 %vm477_vm4, %v521_v22  ;;  %v733_v63 = vadd.f32 %v2224_v16, %v3204_v45 }
 0x41a   :  { %2436 = vrot.lane.b32.xlu2 %v2970_v40, %s2671_s19  ;;  %v750_v40 = vmul.f32 1.442695, %v724_v52 }
 0x41b   :  { %v756_v26 = vmul.f32 1.442695, %v733_v63 }
 0x41c   :  { %2512 = vpow2.f32 %v750_v40 }
 0x41d   :  { %v3332_v28 = vpop.permute.xlu0 %932  ;;  %2514 = vpow2.f32 %v756_v26 }
 0x41e   :  { %2516 = vpow2.f32 %v758_v5 }
 0x41f   :  { %v1227_v0 = vpop.permute.xlu2 %1226  ;;  %2518 = vpow2.f32 %v764_v15 }
 0x421   :  { %2219 = vmatmul.msk.f32.gmra.mxu2 %vm477_vm4, %v522_v58 }
 0x422   :  { %2441 = vrot.lane.b32.xlu2 %v2980_v41, %s2670_s18  ;;  %v3334_v23 = vpop.eup %2512 }
 0x423   :  { %v768_v45 = vsel %vm477_vm4, %v3334_v23, 0.0  ;;  %v3347_v10 = vpop.eup %2514 }
 0x424   :  { %v777_v11 = vsel %vm477_vm4, %v3347_v10, 0.0  ;;  %v3354_v37 = vpop.eup %2516 }
 0x425   :  { %v1223_v35 = vpop.permute.xlu0 %1222  ;;  %v780_v55 = vsel %vm477_vm4, %v3354_v37, 0.0  ;;  %v3364_v43 = vpop.eup %2518 }
 0x426   :  { %v789_v33 = vsel %vm477_vm4, %v3364_v43, 0.0 }
 0x427   :  { %v3321_v39 = vpop.permute.xlu1 %928  ;;  %v3340_v2 = vpop.permute.xlu2 %2396 }
 0x428   :  { %v2398_v15 = vunpack.i.l.bf16 %v3340_v2 }
 0x42d   :  { %v3376_v53 = vpop.permute.xlu0 %938 }
 0x42f   :  { %v1219_v62 = vpop.permute.xlu1 %1218  ;;  %v3352_v25 = vpop.permute.xlu2 %2406 }
 0x430   :  { %2317 = vmatmul.msk.f32.gmra.mxu3 %vm378_vm1, %v1219_v62 }
 0x435   :  { %v2392_v58 = vpop.permute.xlu0 %2391 }
 0x437   :  { %v3345_v9 = vpop.permute.xlu1 %934 }
 0x438   :  { %2318 = vmatmul.msk.f32.gmra.mxu3 %vm378_vm1, %v1221_v60 }
 0x43a   :  { %769 = vadd.xlane.f32.xlu1 %v768_v45 }
 0x43d   :  { %v2402_v16 = vpop.permute.xlu0 %2401 }
 0x43f   :  { %v1225_v18 = vpop.permute.xlu1 %1224 }
 0x440   :  { %2319 = vmatmul.msk.f32.gmra.mxu3 %vm378_vm1, %v1223_v35  ;;  %v2393_v35 = vunpack.i.l.bf16 %v2392_v58 }
 0x442   :  { %778 = vadd.xlane.f32.xlu1 %v777_v11 }
 0x448   :  { %v747_v21 = vpop.f32.mrf.mxu3  ;;  %2320 = vmatmul.msk.f32.gmra.mxu3 %vm378_vm1, %v1225_v18  ;;  %v2403_v18 = vunpack.i.l.bf16 %v2402_v16 }
 0x449   :  { %v748_v14 = vadd.f32 %v2229_v17, %v747_v21  ;;  %v2404_v21 = vunpack.i.h.bf16 %v2402_v16 }
 0x44a   :  { %781 = vadd.xlane.f32.xlu1 %v780_v55  ;;  %v2408_v55 = vunpack.i.l.bf16 %v3352_v25 }
 0x44b   :  { %v766_v30 = vmul.f32 1.442695, %v748_v14 }
 0x44d   :  { %2520 = vpow2.f32 %v766_v30  ;;  %v3362_v42 = vpop.xlane.xlu2 %775 }
 0x450   :  { %2321 = vmatmul.msk.f32.gmra.mxu3 %vm378_vm1, %v1227_v0 }
 0x452   :  { %790 = vadd.xlane.f32.xlu1 %v789_v33 }
 0x453   :  { %v3372_v46 = vpop.eup %2520  ;;  %v1299_v49 = vpop.f32.mrf.mxu3 }
 0x454   :  { %v1300_v47 = vadd.f32 %v2295_v44, %v1299_v49  ;;  %v792_v51 = vsel %vm502_vm5, %v3372_v46, 0.0 }
 0x455   :  { %793 = vadd.xlane.f32.xlu0 %v792_v51  ;;  %v3378_v13 = vpop.xlane.xlu2 %787 }
 0x456   :  { %v1326_v57 = vmul.f32 1.442695, %v1300_v47  ;;  %v3421_v47 = vpop.f32.mrf.mxu2 }
 0x458   :  { %2522 = vpow2.f32 %v1326_v57 }
 0x45b   :  { %v1302_v50 = vpop.f32.mrf.mxu3 }
 0x45c   :  { %v1303_v34 = vadd.f32 %v2296_v48, %v1302_v50 }
 0x45d   :  { %v1118_v22 = vpop.permute.xlu2 %1117 }
 0x45e   :  { %v3383_v36 = vpop.eup %2522  ;;  %v1328_v60 = vmul.f32 1.442695, %v1303_v34  ;;  %2285 = vmatpush.msk.msrb.mxu1 %vm577_vm3, %v1118_v22 }
 0x45f   :  { %v1344_v27 = vsel %vm477_vm4, %v3383_v36, 0.0 }
 0x460   :  { %2524 = vpow2.f32 %v1328_v60  ;;  %1345 = vadd.xlane.f32.xlu0 %v1344_v27 }
 0x465   :  { %v3392_v62 = vpop.permute.xlu2 %2416 }
 0x466   :  { %v3388_v52 = vpop.eup %2524  ;;  %v2418_v16 = vunpack.i.l.bf16 %v3392_v62 }
 0x467   :  { %v1347_v40 = vsel %vm477_vm4, %v3388_v52, 0.0 }
 0x468   :  { %1348 = vadd.xlane.f32.xlu0 %v1347_v40  ;;  %v773_v26 = vpop.xlane.xlu0 %772 }
 0x46a   :  { %v505_v63 = vpop.xlane.xlu1 %504 }
 0x46b   :  { %2526 = vrcp.f32 %v505_v63  ;;  %1405 = vrot.lane.b32.xlu1 %v2922_v31, %s2671_s19  ;;  %v2419_v63 = vunpack.i.h.bf16 %v3392_v62 }
 0x46d   :  { %v3397_v1 = vpop.permute.xlu2 %2426 }
 0x470   :  { %v3400_v45 = vpop.xlane.xlu0 %784 }
 0x471   :  { %v2527_v0 = vpop.eup %2526 }
 0x472   :  { %v523_v56 = vmul.f32 %v2527_v0, %v3273_v24  ;;  %v2394_v24 = vunpack.i.h.bf16 %v2392_v58  ;;  %v2428_v0 = vunpack.i.l.bf16 %v3397_v1 }
 0x474   :  { %2220 = vmatmul.msk.f32.gmra.mxu2 %vm477_vm4, %v523_v56 }
 0x475   :  { %v2432_v5 = vpop.permute.xlu2 %2431 }
 0x476   :  { %v2433_v30 = vunpack.i.l.bf16 %v2432_v5  ;;  %v2434_v44 = vunpack.i.h.bf16 %v2432_v5 }
 0x47c   :  { %2276 = vmatmul.msk.f32.vlgmr.msrb.gmra.mxu2 %vm378_vm1, %v3247_v3  ;;  %v2399_v3 = vunpack.i.h.bf16 %v3340_v2  ;;  %v2409_v2 = vunpack.i.h.bf16 %v3352_v25 }
 0x47d   :  { %v3407_v11 = vpop.permute.xlu2 %2436 }
 0x47e   :  { %v2438_v56 = vunpack.i.l.bf16 %v3407_v11  ;;  %v2439_v62 = vunpack.i.h.bf16 %v3407_v11 }
 0x482   :  { %v830_v6 = vpop.permute.xlu1 %829 }
 0x483   :  { %2248 = vmatpush.msk.msrb.mxu0 %vm577_vm3, %v830_v6  ;;  %v2412_v8 = vpop.permute.xlu0 %2411 }
 0x484   :  { %2277 = vmatmul.msk.f32.gmra.mxu2 %vm378_vm1, %v3254_v29  ;;  %v2413_v31 = vunpack.i.l.bf16 %v2412_v8  ;;  %v2414_v32 = vunpack.i.h.bf16 %v2412_v8 }
 0x485   :  { %876 = vmatpush.msrb.mxu0 %v2393_v35  ;;  %v2442_v33 = vpop.permute.xlu2 %2441 }
 0x486   :  { %1164 = vmatpush.msrb.mxu1 %v2413_v31  ;;  %v2444_v49 = vunpack.i.h.bf16 %v2442_v33  ;;  %v2258_v31 = vld [vmem:[%s4027_s4 + $0x90] sm:$0xff] }
 0x487   :  { %877 = vmatpush.msrb.mxu0 %v2394_v24 }
 0x488   :  { %1165 = vmatpush.msrb.mxu1 %v2414_v32 }
 0x489   :  { %878 = vmatpush.msrb.mxu0 %v2398_v15 }
 0x48b   :  { %v2422_v17 = vpop.permute.xlu0 %2421  ;;  %879 = vmatpush.msrb.mxu0 %v2399_v3 }
 0x48c   :  { %2278 = vmatmul.msk.f32.gmra.mxu2 %vm378_vm1, %v3293_v54  ;;  %v2423_v29 = vunpack.i.l.bf16 %v2422_v17  ;;  %v2424_v14 = vunpack.i.h.bf16 %v2422_v17  ;;  %v2443_v54 = vunpack.i.l.bf16 %v2442_v33  ;;  %v1305_v17 = vpop.f32.mrf.mxu3 }
 0x48d   :  { %880 = vmatpush.msrb.mxu0 %v2403_v18 }
 0x48e   :  { %1166 = vmatpush.msrb.mxu1 %v2423_v29 }
 0x48f   :  { %881 = vmatpush.msrb.mxu0 %v2404_v21  ;;  %v2260_v21 = vld [vmem:[%s4027_s4 + $0xa0] sm:$0xff] }
 0x490   :  { %1167 = vmatpush.msrb.mxu1 %v2424_v14  ;;  %v2297_v14 = vld [vmem:[%s4027_s4 + $0xe8] sm:$0xff] }
 0x491   :  { %882 = vmatpush.msrb.mxu0 %v2408_v55 }
 0x492   :  { %1168 = vmatpush.msrb.mxu1 %v2433_v30 }
 0x493   :  { %883 = vmatpush.msrb.mxu0 %v2409_v2 }
 0x494   :  { %2279 = vmatmul.msk.f32.gmra.mxu2 %vm378_vm1, %v3321_v39  ;;  %1169 = vmatpush.msrb.mxu1 %v2434_v44  ;;  %v3427_v39 = vpop.f32.mrf.mxu2  ;;  %v1306_v44 = vadd.f32 %v2297_v14, %v1305_v17  ;;  %v2302_v14 = vld [vmem:[%s4027_s4 + $0x110] sm:$0xff] }
 0x496   :  { %1170 = vmatpush.msrb.mxu1 %v2443_v54 }
 0x498   :  { %1171 = vmatpush.msrb.mxu1 %v2444_v49 }
 0x499   :  { %v1308_v33 = vpop.f32.mrf.mxu3 }
 0x49c   :  { %2280 = vmatmul.msk.f32.gmra.mxu2 %vm378_vm1, %v3303_v19 }
 0x4a4   :  { %2281 = vmatmul.msk.f32.gmra.mxu2 %vm378_vm1, %v3332_v28 }
 0x4ac   :  { %2282 = vmatmul.msk.f32.gmra.mxu2 %vm378_vm1, %v3345_v9  ;;  %v3435_v9 = vpop.f32.mrf.mxu2 }
 0x4ad   :  { %v770_v25 = vpop.xlane.xlu1 %769 }
 0x4ae   :  { %2528 = vrcp.f32 %v770_v25  ;;  %v1330_v25 = vmul.f32 1.442695, %v1306_v44 }
 0x4af   :  { %2530 = vrcp.f32 %v773_v26  ;;  %v2429_v26 = vunpack.i.h.bf16 %v3397_v1 }
 0x4b0   :  { %2532 = vrcp.f32 %v3362_v42 }
 0x4b4   :  { %v2529_v51 = vpop.eup %2528  ;;  %2283 = vmatmul.msk.f32.gmra.mxu2 %vm378_vm1, %v3319_v61 }
 0x4b5   :  { %v804_v57 = vmul.f32 %v2529_v51, %v3334_v23  ;;  %v2531_v19 = vpop.eup %2530  ;;  %v779_v48 = vpop.xlane.xlu1 %778  ;;  %v2298_v51 = vld [vmem:[%s4027_s4 + $0xf0] sm:$0xff] }
 0x4b6   :  { %v805_v28 = vmul.f32 %v2531_v19, %v3271_v12  ;;  %v2533_v61 = vpop.eup %2532  ;;  %2534 = vrcp.f32 %v779_v48  ;;  %v3439_v23 = vpop.f32.mrf.mxu2  ;;  %v1309_v48 = vadd.f32 %v2298_v51, %v1308_v33 }
 0x4b7   :  { %2249 = vmatmul.msk.f32.vlgmr.msrb.gmra.mxu0 %vm477_vm4, %v804_v57  ;;  %v806_v50 = vmul.f32 %v2533_v61, %v3249_v4  ;;  %v1311_v19 = vpop.f32.mrf.mxu3 }
 0x4bc   :  { %2284 = vmatmul.msk.f32.gmra.mxu2 %vm378_vm1, %v3376_v53  ;;  %v2535_v42 = vpop.eup %2534 }
 0x4bd   :  { %v782_v34 = vpop.xlane.xlu1 %781  ;;  %v807_v53 = vmul.f32 %v2535_v42, %v3347_v10  ;;  %v2299_v42 = vld [vmem:[%s4027_s4 + $0xf8] sm:$0xff] }
 0x4be   :  { %2536 = vrcp.f32 %v782_v34  ;;  %v3444_v12 = vpop.f32.mrf.mxu2  ;;  %v1332_v34 = vmul.f32 1.442695, %v1309_v48 }
 0x4bf   :  { %2250 = vmatmul.msk.f32.gmra.mxu0 %vm477_vm4, %v805_v28  ;;  %2538 = vrcp.f32 %v3400_v45 }
 0x4c0   :  { %2540 = vrcp.f32 %v3378_v13 }
 0x4c4   :  { %v2537_v22 = vpop.eup %2536 }
 0x4c5   :  { %v791_v60 = vpop.xlane.xlu1 %790  ;;  %v808_v58 = vmul.f32 %v2537_v22, %v3354_v37  ;;  %v2539_v4 = vpop.eup %2538 }
 0x4c6   :  { %v3449_v27 = vpop.f32.mrf.mxu2  ;;  %v809_v10 = vmul.f32 %v2539_v4, %v3279_v38  ;;  %v2541_v37 = vpop.eup %2540  ;;  %2542 = vrcp.f32 %v791_v60 }
 0x4c7   :  { %2251 = vmatmul.msk.f32.gmra.mxu0 %vm477_vm4, %v806_v50  ;;  %v810_v38 = vmul.f32 %v2541_v37, %v3256_v7  ;;  %v2262_v50 = vld [vmem:[%s4027_s4 + $0xb0] sm:$0xff]  ;;  %v2300_v37 = vld [vmem:[%s4027_s4 + $0x100] sm:$0xff] }
 0x4c8   :  { %v794_v45 = vpop.xlane.xlu0 %793 }
 0x4c9   :  { %2544 = vrcp.f32 %v794_v45 }
 0x4cc   :  { %v2543_v5 = vpop.eup %2542 }
 0x4cd   :  { %v811_v1 = vmul.f32 %v2543_v5, %v3364_v43  ;;  %v2259_v43 = vld [vmem:[%s4027_s4 + $0x98] sm:$0xff] }
 0x4ce   :  { %v3459_v13 = vpop.f32.mrf.mxu2 }
 0x4cf   :  { %2252 = vmatmul.msk.f32.gmra.mxu0 %vm477_vm4, %v807_v53  ;;  %v2545_v8 = vpop.eup %2544 }
 0x4d0   :  { %v812_v7 = vmul.f32 %v2545_v8, %v3372_v46  ;;  %v2264_v8 = vld [vmem:[%s4027_s4 + $0xc0] sm:$0xff] }
 0x4d6   :  { %v3466_v6 = vpop.f32.mrf.mxu2 }
 0x4d7   :  { %2253 = vmatmul.msk.f32.gmra.mxu0 %vm477_vm4, %v808_v58  ;;  %v1312_v58 = vadd.f32 %v2299_v42, %v1311_v19 }
 0x4dd   :  { %v1406_v40 = vpop.permute.xlu1 %1405 }
 0x4de   :  { %2322 = vmatpush.msk.msra.mxu0 %vm577_vm3, %v1406_v40  ;;  %v1314_v40 = vpop.f32.mrf.mxu3 }
 0x4df   :  { %2254 = vmatmul.msk.f32.gmra.mxu0 %vm477_vm4, %v809_v10 }
 0x4e0   :  { %1452 = vmatpush.msra.mxu0 %v2418_v16  ;;  %v2263_v16 = vld [vmem:[%s4027_s4 + $0xb8] sm:$0xff] }
 0x4e2   :  { %1453 = vmatpush.msra.mxu0 %v2419_v63  ;;  %v1334_v63 = vmul.f32 1.442695, %v1312_v58 }
 0x4e4   :  { %1454 = vmatpush.msra.mxu0 %v2428_v0 }
 0x4e6   :  { %1455 = vmatpush.msra.mxu0 %v2429_v26 }
 0x4e7   :  { %2255 = vmatmul.msk.f32.gmra.mxu0 %vm477_vm4, %v810_v38 }
 0x4e8   :  { %1456 = vmatpush.msra.mxu0 %v2438_v56 }
 0x4ea   :  { %1457 = vmatpush.msra.mxu0 %v2439_v62  ;;  %v1315_v62 = vadd.f32 %v2300_v37, %v1314_v40  ;;  %v2303_v40 = vld [vmem:[%s4027_s4 + $0x118] sm:$0xf] }
 0x4ef   :  { %2256 = vmatmul.msk.f32.gmra.mxu0 %vm477_vm4, %v811_v1  ;;  %v1317_v1 = vpop.f32.mrf.mxu3 }
 0x4f7   :  { %v3470_v35 = vpop.f32.mrf.mxu2  ;;  %2257 = vmatmul.msk.f32.gmra.mxu0 %vm477_vm4, %v812_v7  ;;  %v1336_v7 = vmul.f32 1.442695, %v1315_v62 }
 0x4ff   :  { %v1011_v24 = vpop.f32.mrf.mxu2 }
 0x500   :  { %v1012_v32 = vadd.f32 %v2258_v31, %v1011_v24  ;;  %v2301_v31 = vld [vmem:[%s4027_s4 + $0x108] sm:$0xff] }
 0x502   :  { %v1038_v11 = vmul.f32 1.442695, %v1012_v32 }
 0x504   :  { %2546 = vpow2.f32 %v1038_v11 }
 0x507   :  { %v1014_v15 = vpop.f32.mrf.mxu2 }
 0x508   :  { %v1015_v3 = vadd.f32 %v2259_v43, %v1014_v15  ;;  %v1318_v15 = vadd.f32 %v2301_v31, %v1317_v1 }
 0x50a   :  { %v3479_v46 = vpop.eup %2546  ;;  %v1040_v18 = vmul.f32 1.442695, %v1015_v3 }
 0x50b   :  { %v1056_v29 = vsel %vm477_vm4, %v3479_v46, 0.0 }
 0x50c   :  { %2548 = vpow2.f32 %v1040_v18  ;;  %1057 = vadd.xlane.f32.xlu1 %v1056_v29  ;;  %v2265_v29 = vld [vmem:[%s4027_s4 + $0xc8] sm:$0xff] }
 0x50f   :  { %v1017_v55 = vpop.f32.mrf.mxu2 }
 0x510   :  { %v1018_v30 = vadd.f32 %v2260_v21, %v1017_v55  ;;  %v1338_v21 = vmul.f32 1.442695, %v1318_v15  ;;  %v1320_v55 = vpop.f32.mrf.mxu3 }
 0x512   :  { %v3489_v2 = vpop.eup %2548  ;;  %v1042_v54 = vmul.f32 1.442695, %v1018_v30 }
 0x513   :  { %v1059_v49 = vsel %vm477_vm4, %v3489_v2, 0.0 }
 0x514   :  { %2550 = vpow2.f32 %v1042_v54  ;;  %1060 = vadd.xlane.f32.xlu2 %v1059_v49  ;;  %v1321_v49 = vadd.f32 %v2302_v14, %v1320_v55 }
 0x515   :  { %2552 = vpow2.f32 %v1330_v25  ;;  %v2261_v25 = vld [vmem:[%s4027_s4 + $0xa8] sm:$0xff] }
 0x516   :  { %2554 = vpow2.f32 %v1332_v34  ;;  %v1340_v34 = vmul.f32 1.442695, %v1321_v49 }
 0x517   :  { %v3496_v57 = vpop.f32.mrf.mxu2 }
 0x51a   :  { %v3498_v28 = vpop.eup %2550 }
 0x51b   :  { %v1062_v61 = vsel %vm477_vm4, %v3498_v28, 0.0  ;;  %v3508_v22 = vpop.eup %2552 }
 0x51c   :  { %1063 = vadd.xlane.f32.xlu0 %v1062_v61  ;;  %v1350_v10 = vsel %vm477_vm4, %v3508_v22, 0.0  ;;  %v3520_v26 = vpop.eup %2554  ;;  %v1021_v61 = vadd.f32 %v2261_v25, %v3496_v57 }
 0x51e   :  { %v1044_v58 = vmul.f32 1.442695, %v1021_v61 }
 0x51f   :  { %v1023_v53 = vpop.f32.mrf.mxu2 }
 0x520   :  { %v1024_v60 = vadd.f32 %v2262_v50, %v1023_v53  ;;  %v2266_v50 = vld [vmem:[%s4027_s4 + $0xd0] sm:$0xf]  ;;  %s2672_s4 = smov 8  }
 0x522   :  { %v1046_v4 = vmul.f32 1.442695, %v1024_v60 }
 0x524   :  { %2556 = vpow2.f32 %v1046_v4  ;;  %1351 = vadd.xlane.f32.xlu0 %v1350_v10  ;;  %v1323_v10 = vpop.f32.mrf.mxu3 }
 0x525   :  { %2446 = vrot.lane.b32.xlu1 %v2980_v41, %s2671_s19  ;;  %2558 = vpow2.f32 %v1334_v63  ;;  %v1353_v41 = vsel %vm477_vm4, %v3520_v26, 0.0  ;;  %v1324_v37 = vadd.f32 %v2303_v40, %v1323_v10 }
 0x527   :  { %v1026_v0 = vpop.f32.mrf.mxu2 }
 0x528   :  { %v1027_v38 = vadd.f32 %v2263_v16, %v1026_v0 }
 0x52a   :  { %v3522_v56 = vpop.eup %2556  ;;  %v1048_v45 = vmul.f32 1.442695, %v1027_v38  ;;  %v1342_v38 = vmul.f32 1.442695, %v1324_v37 }
 0x52b   :  { %v1068_v5 = vsel %vm477_vm4, %v3522_v56, 0.0  ;;  %v3534_v32 = vpop.eup %2558 }
 0x52c   :  { %2560 = vpow2.f32 %v1048_v45  ;;  %1354 = vadd.xlane.f32.xlu0 %v1353_v41  ;;  %1069 = vadd.xlane.f32.xlu2 %v1068_v5  ;;  %v1356_v17 = vsel %vm477_vm4, %v3534_v32, 0.0 }
 0x52d   :  { %2562 = vpow2.f32 %v1336_v7 }
 0x52f   :  { %v1029_v24 = vpop.f32.mrf.mxu2 }
 0x530   :  { %v1030_v11 = vadd.f32 %v2264_v8, %v1029_v24 }
 0x532   :  { %v3536_v43 = vpop.eup %2560  ;;  %v1050_v3 = vmul.f32 1.442695, %v1030_v11  ;;  %v1346_v11 = vpop.xlane.xlu0 %1345 }
 0x533   :  { %v1071_v18 = vsel %vm477_vm4, %v3536_v43, 0.0  ;;  %v3548_v33 = vpop.eup %2562 }
 0x534   :  { %2564 = vpow2.f32 %v1050_v3  ;;  %1357 = vadd.xlane.f32.xlu0 %v1356_v17  ;;  %1072 = vadd.xlane.f32.xlu2 %v1071_v18  ;;  %v1359_v19 = vsel %vm477_vm4, %v3548_v33, 0.0  ;;  %v885_v31 = vpop.f32.mrf.mxu0 }
 0x535   :  { %2566 = vpow2.f32 %v1338_v21 }
 0x537   :  { %v1032_v30 = vpop.f32.mrf.mxu2 }
 0x538   :  { %v1033_v44 = vadd.f32 %v2265_v29, %v1032_v30 }
 0x53a   :  { %v3550_v54 = vpop.eup %2564  ;;  %v1052_v51 = vmul.f32 1.442695, %v1033_v44  ;;  %v1349_v17 = vpop.xlane.xlu0 %1348 }
 0x53b   :  { %v1074_v48 = vsel %vm477_vm4, %v3550_v54, 0.0  ;;  %v3563_v53 = vpop.eup %2566 }
 0x53c   :  { %2568 = vpow2.f32 %v1052_v51  ;;  %1360 = vadd.xlane.f32.xlu0 %v1359_v19  ;;  %1075 = vadd.xlane.f32.xlu2 %v1074_v48  ;;  %v1362_v57 = vsel %vm477_vm4, %v3563_v53, 0.0  ;;  %v888_v24 = vpop.f32.mrf.mxu0 }
 0x53d   :  { %2570 = vpow2.f32 %v1340_v34 }
 0x53f   :  { %v1035_v42 = vpop.f32.mrf.mxu2 }
 0x540   :  { %v1036_v60 = vadd.f32 %v2266_v50, %v1035_v42 }
 0x542   :  { %v3565_v4 = vpop.eup %2568  ;;  %v1054_v16 = vmul.f32 1.442695, %v1036_v60 }
 0x543   :  { %v1077_v63 = vsel %vm477_vm4, %v3565_v4, 0.0  ;;  %v3574_v0 = vpop.eup %2570 }
 0x544   :  { %2572 = vpow2.f32 %v1054_v16  ;;  %1363 = vadd.xlane.f32.xlu0 %v1362_v57  ;;  %1078 = vadd.xlane.f32.xlu2 %v1077_v63  ;;  %v1365_v41 = vsel %vm477_vm4, %v3574_v0, 0.0 }
 0x545   :  { %2574 = vpow2.f32 %v1044_v58 }
 0x546   :  { %2576 = vpow2.f32 %v1342_v38 }
 0x54a   :  { %v3576_v62 = vpop.eup %2572 }
 0x54b   :  { %v3578_v45 = vpop.eup %2574  ;;  %v1080_v5 = vsel %vm502_vm5, %v3576_v62, 0.0 }
 0x54c   :  { %1366 = vadd.xlane.f32.xlu0 %v1365_v41  ;;  %1081 = vadd.xlane.f32.xlu2 %v1080_v5  ;;  %v1065_v1 = vsel %vm477_vm4, %v3578_v45, 0.0  ;;  %v3586_v8 = vpop.eup %2576 }
 0x54d   :  { %v1368_v7 = vsel %vm502_vm5, %v3586_v8, 0.0 }
 0x54f   :  { %1066 = vadd.xlane.f32.xlu1 %v1065_v1 }
 0x557   :  { %1369 = vadd.xlane.f32.xlu1 %v1368_v7 }
 0x560   :  { %1497 = vrot.lane.b32.xlu0 %v885_v31, %s2672_s4 }
 0x568   :  { %1499 = vrot.lane.b32.xlu0 %v888_v24, %s2672_s4 }
 0x57f   :  { %v1058_v15 = vpop.xlane.xlu1 %1057 }
 0x580   :  { %2578 = vrcp.f32 %v1058_v15 }
 0x586   :  { %v2579_v3 = vpop.eup %2578 }
 0x587   :  { %v1061_v18 = vpop.xlane.xlu2 %1060  ;;  %v1092_v29 = vmul.f32 %v2579_v3, %v3479_v46 }
 0x588   :  { %2580 = vrcp.f32 %v1061_v18 }
 0x589   :  { %2286 = vmatmul.msk.f32.vlgmr.msrb.gmra.mxu1 %vm477_vm4, %v1092_v29 }
 0x58e   :  { %v2581_v21 = vpop.eup %2580 }
 0x58f   :  { %v1064_v14 = vpop.xlane.xlu0 %1063  ;;  %v1093_v55 = vmul.f32 %v2581_v21, %v3489_v2 }
 0x590   :  { %2582 = vrcp.f32 %v1064_v14 }
 0x591   :  { %2287 = vmatmul.msk.f32.gmra.mxu1 %vm477_vm4, %v1093_v55  ;;  %2584 = vrcp.f32 %v1346_v11 }
 0x592   :  { %2586 = vrcp.f32 %v1349_v17 }
 0x596   :  { %v2583_v30 = vpop.eup %2582 }
 0x597   :  { %v1352_v44 = vpop.xlane.xlu0 %1351  ;;  %v2447_v49 = vpop.permute.xlu1 %2446  ;;  %v1094_v25 = vmul.f32 %v2583_v30, %v3498_v28 }
 0x598   :  { %v2585_v51 = vpop.eup %2584  ;;  %v2448_v19 = vunpack.i.l.bf16 %v2447_v49  ;;  %v2449_v46 = vunpack.i.h.bf16 %v2447_v49  ;;  %2588 = vrcp.f32 %v1352_v44 }
 0x599   :  { %2288 = vmatmul.msk.f32.gmra.mxu1 %vm477_vm4, %v1094_v25  ;;  %v1380_v48 = vmul.f32 %v2585_v51, %v3383_v36  ;;  %v2587_v61 = vpop.eup %2586 }
 0x59a   :  { %1458 = vmatpush.msra.mxu0 %v2448_v19  ;;  %v1381_v50 = vmul.f32 %v2587_v61, %v3388_v52  ;;  %v1628_v61 = vld [vmem:[%s4028_s3 + $0x18] sm:$0xff] }
 0x59b   :  { %1668 = vmatpush.msra.mxu2 %v1628_v61 }
 0x59c   :  { %1459 = vmatpush.msra.mxu0 %v2449_v46 }
 0x59d   :  { %2323 = vmatmul.msk.f32.vlgmr.msra.gmra.mxu0 %vm477_vm4, %v1380_v48 }
 0x59e   :  { %v2589_v28 = vpop.eup %2588 }
 0x59f   :  { %v1355_v2 = vpop.xlane.xlu0 %1354  ;;  %v1382_v42 = vmul.f32 %v2589_v28, %v3508_v22  ;;  %v1070_v16 = vpop.xlane.xlu2 %1069 }
 0x5a0   :  { %2590 = vrcp.f32 %v1355_v2 }
 0x5a5   :  { %2324 = vmatmul.msk.f32.gmra.mxu0 %vm477_vm4, %v1381_v50 }
 0x5a6   :  { %v2591_v60 = vpop.eup %2590 }
 0x5a7   :  { %v1358_v34 = vpop.xlane.xlu0 %1357  ;;  %v1383_v58 = vmul.f32 %v2591_v60, %v3520_v26  ;;  %v1073_v38 = vpop.xlane.xlu2 %1072 }
 0x5a8   :  { %2592 = vrcp.f32 %v1358_v34  ;;  %v1627_v34 = vld [vmem:[%s4028_s3 + $0x10] sm:$0xff] }
 0x5a9   :  { %1669 = vmatpush.msra.mxu2 %v1627_v34 }
 0x5ad   :  { %2325 = vmatmul.msk.f32.gmra.mxu0 %vm477_vm4, %v1382_v42 }
 0x5ae   :  { %v2593_v40 = vpop.eup %2592 }
 0x5af   :  { %v1361_v36 = vpop.xlane.xlu0 %1360  ;;  %v1384_v52 = vmul.f32 %v2593_v40, %v3534_v32  ;;  %v1626_v40 = vld [vmem:[%s4028_s3 + $0x8] sm:$0xff] }
 0x5b0   :  { %2594 = vrcp.f32 %v1361_v36  ;;  %1670 = vmatpush.msra.mxu2 %v1626_v40 }
 0x5b5   :  { %2326 = vmatmul.msk.f32.gmra.mxu0 %vm477_vm4, %v1383_v58 }
 0x5b6   :  { %v2595_v57 = vpop.eup %2594 }
 0x5b7   :  { %v1364_v10 = vpop.xlane.xlu0 %1363  ;;  %v1385_v63 = vmul.f32 %v2595_v57, %v3548_v33  ;;  %v1076_v33 = vpop.xlane.xlu2 %1075 }
 0x5b8   :  { %2596 = vrcp.f32 %v1364_v10 }
 0x5bd   :  { %2327 = vmatmul.msk.f32.gmra.mxu0 %vm477_vm4, %v1384_v52  ;;  %v1625_v52 = vld [vmem:[%s4028_s3] sm:$0xff] }
 0x5be   :  { %v2597_v26 = vpop.eup %2596  ;;  %1671 = vmatpush.msra.mxu2 %v1625_v52 }
 0x5bf   :  { %v1367_v37 = vpop.xlane.xlu0 %1366  ;;  %v1386_v5 = vmul.f32 %v2597_v26, %v3563_v53  ;;  %v1079_v18 = vpop.xlane.xlu2 %1078 }
 0x5c2   :  { %v1067_v22 = vpop.xlane.xlu1 %1066 }
 0x5c3   :  { %2598 = vrcp.f32 %v1067_v22 }
 0x5c4   :  { %2600 = vrcp.f32 %v1070_v16 }
 0x5c5   :  { %2328 = vmatmul.msk.f32.gmra.mxu0 %vm477_vm4, %v1385_v63  ;;  %2602 = vrcp.f32 %v1367_v37 }
 0x5c6   :  { %2604 = vrcp.f32 %v1073_v38 }
 0x5c7   :  { %v1082_v21 = vpop.xlane.xlu2 %1081 }
 0x5c9   :  { %v2599_v41 = vpop.eup %2598 }
 0x5ca   :  { %v1095_v32 = vmul.f32 %v2599_v41, %v3578_v45  ;;  %v2601_v1 = vpop.eup %2600  ;;  %v1370_v7 = vpop.xlane.xlu1 %1369 }
 0x5cb   :  { %v2603_v31 = vpop.eup %2602  ;;  %2606 = vrcp.f32 %v1370_v7  ;;  %v1096_v24 = vmul.f32 %v2601_v1, %v3522_v56  ;;  %v891_v45 = vpop.f32.mrf.mxu0 }
 0x5cc   :  { %2289 = vmatmul.msk.f32.gmra.mxu1 %vm477_vm4, %v1095_v32  ;;  %v1387_v11 = vmul.f32 %v2603_v31, %v3574_v0  ;;  %v2605_v53 = vpop.eup %2604  ;;  %2608 = vrcp.f32 %v1076_v33 }
 0x5cd   :  { %2329 = vmatmul.msk.f32.gmra.mxu0 %vm477_vm4, %v1386_v5  ;;  %v1097_v3 = vmul.f32 %v2605_v53, %v3536_v43  ;;  %2610 = vrcp.f32 %v1079_v18 }
 0x5ce   :  { %2612 = vrcp.f32 %v1082_v21 }
 0x5d1   :  { %v2607_v15 = vpop.eup %2606 }
 0x5d2   :  { %v1388_v17 = vmul.f32 %v2607_v15, %v3586_v8  ;;  %v2609_v56 = vpop.eup %2608  ;;  %v1498_v37 = vpop.permute.xlu0 %1497 }
 0x5d3   :  { %v894_v29 = vpop.f32.mrf.mxu0  ;;  %v1098_v0 = vmul.f32 %v2609_v56, %v3550_v54  ;;  %v2611_v14 = vpop.eup %2610  ;;  %v1596_v38 = vsel %vm378_vm1, %v3421_v47, %v1498_v37  ;;  %v2652_v37 = vld [vmem:[%s4024_s0 + $0x8] sm:$0xff] }
 0x5d4   :  { %2290 = vmatmul.msk.f32.gmra.mxu1 %vm477_vm4, %v1096_v24  ;;  %v1099_v43 = vmul.f32 %v2611_v14, %v3565_v4  ;;  %v2613_v8 = vpop.eup %2612 }
 0x5d5   :  { %2330 = vmatmul.msk.f32.gmra.mxu0 %vm477_vm4, %v1387_v11  ;;  %v1100_v30 = vmul.f32 %v2613_v8, %v3576_v62 }
 0x5da   :  { %v1500_v41 = vpop.permute.xlu0 %1499 }
 0x5db   :  { %v897_v55 = vpop.f32.mrf.mxu0  ;;  %v1597_v31 = vsel %vm378_vm1, %v3427_v39, %v1500_v41 }
 0x5dc   :  { %2291 = vmatmul.msk.f32.gmra.mxu1 %vm477_vm4, %v1097_v3 }
 0x5dd   :  { %2331 = vmatmul.msk.f32.gmra.mxu0 %vm477_vm4, %v1388_v17 }
 0x5e3   :  { %v900_v44 = vpop.f32.mrf.mxu0 }
 0x5e4   :  { %2292 = vmatmul.msk.f32.gmra.mxu1 %vm477_vm4, %v1098_v0 }
 0x5eb   :  { %v903_v49 = vpop.f32.mrf.mxu0 }
 0x5ec   :  { %2293 = vmatmul.msk.f32.gmra.mxu1 %vm477_vm4, %v1099_v43 }
 0x5f3   :  { %v906_v54 = vpop.f32.mrf.mxu0 }
 0x5f4   :  { %2294 = vmatmul.msk.f32.gmra.mxu1 %vm477_vm4, %v1100_v30 }
 0x5fb   :  { %v909_v19 = vpop.f32.mrf.mxu0 }
 0x606   :  { %v1173_v25 = vpop.f32.mrf.mxu1 }
 0x607   :  { %1533 = vrot.lane.b32.xlu2 %v1173_v25, %s2673_s24 }
 0x60e   :  { %v1176_v51 = vpop.f32.mrf.mxu1 }
 0x60f   :  { %1535 = vrot.lane.b32.xlu2 %v1176_v51, %s2673_s24 }
 0x616   :  { %v1179_v46 = vpop.f32.mrf.mxu1 }
 0x617   :  { %1537 = vrot.lane.b32.xlu2 %v1179_v46, %s2673_s24 }
 0x61a   :  { %v1461_v4 = vpop.f32.mrf.mxu0 }
 0x61b   :  { %1569 = vrot.lane.b32.xlu1 %v1461_v4, %s2674_s25 }
 0x622   :  { %v1464_v62 = vpop.f32.mrf.mxu0 }
 0x623   :  { %1501 = vrot.lane.b32.xlu1 %v891_v45, %s2672_s4  ;;  %1571 = vrot.lane.b32.xlu0 %v1464_v62, %s2674_s25 }
 0x62a   :  { %v1467_v48 = vpop.f32.mrf.mxu0 }
 0x62b   :  { %1503 = vrot.lane.b32.xlu1 %v894_v29, %s2672_s4  ;;  %1573 = vrot.lane.b32.xlu0 %v1467_v48, %s2674_s25 }
 0x632   :  { %v1470_v2 = vpop.f32.mrf.mxu0 }
 0x633   :  { %1505 = vrot.lane.b32.xlu1 %v897_v55, %s2672_s4  ;;  %1575 = vrot.lane.b32.xlu0 %v1470_v2, %s2674_s25 }
 0x63a   :  { %v1473_v50 = vpop.f32.mrf.mxu0 }
 0x63b   :  { %1507 = vrot.lane.b32.xlu1 %v900_v44, %s2672_s4  ;;  %1577 = vrot.lane.b32.xlu0 %v1473_v50, %s2674_s25 }
 0x642   :  { %v1476_v28 = vpop.f32.mrf.mxu0 }
 0x643   :  { %1509 = vrot.lane.b32.xlu1 %v903_v49, %s2672_s4  ;;  %1579 = vrot.lane.b32.xlu0 %v1476_v28, %s2674_s25 }
 0x649   :  { %v1182_v42 = vpop.f32.mrf.mxu1 }
 0x64a   :  { %1539 = vrot.lane.b32.xlu2 %v1182_v42, %s2673_s24  ;;  %v1479_v60 = vpop.f32.mrf.mxu0 }
 0x64b   :  { %1511 = vrot.lane.b32.xlu1 %v906_v54, %s2672_s4  ;;  %1581 = vrot.lane.b32.xlu0 %v1479_v60, %s2674_s25 }
 0x651   :  { %v1185_v36 = vpop.f32.mrf.mxu1 }
 0x652   :  { %1541 = vrot.lane.b32.xlu2 %v1185_v36, %s2673_s24  ;;  %v1482_v58 = vpop.f32.mrf.mxu0 }
 0x653   :  { %1513 = vrot.lane.b32.xlu1 %v909_v19, %s2672_s4  ;;  %1583 = vrot.lane.b32.xlu0 %v1482_v58, %s2674_s25 }
 0x659   :  { %v1188_v10 = vpop.f32.mrf.mxu1 }
 0x65a   :  { %1543 = vrot.lane.b32.xlu2 %v1188_v10, %s2673_s24  ;;  %v1485_v16 = vpop.f32.mrf.mxu0 }
 0x65b   :  { %1585 = vrot.lane.b32.xlu0 %v1485_v16, %s2674_s25 }
 0x661   :  { %v1191_v57 = vpop.f32.mrf.mxu1  ;;  %v1534_v26 = vpop.permute.xlu2 %1533 }
 0x662   :  { %1545 = vrot.lane.b32.xlu2 %v1191_v57, %s2673_s24  ;;  %v1606_v32 = vsel %vm1605_vm6, %v1596_v38, %v1534_v26 }
 0x669   :  { %v1194_v22 = vpop.f32.mrf.mxu1  ;;  %v1536_v7 = vpop.permute.xlu2 %1535 }
 0x66a   :  { %1547 = vrot.lane.b32.xlu2 %v1194_v22, %s2673_s24  ;;  %v1607_v33 = vsel %vm1605_vm6, %v1597_v31, %v1536_v7 }
 0x671   :  { %v1197_v63 = vpop.f32.mrf.mxu1  ;;  %v1538_v53 = vpop.permute.xlu2 %1537 }
 0x672   :  { %1549 = vrot.lane.b32.xlu2 %v1197_v63, %s2673_s24 }
 0x68d   :  { %v1570_v5 = vpop.permute.xlu1 %1569 }
 0x68e   :  { %v1616_v1 = vsel %vm1615_vm7, %v1606_v32, %v1570_v5  ;;  %v2653_v5 = vld [vmem:[%s4024_s0 + $0x10] sm:$0xff] }
 0x68f   :  { %2332 = vmatmul.msk.f32.vlgmr.msra.gmra.mxu2 %vm36_vm0, %v1616_v1 }
 0x695   :  { %v1502_v24 = vpop.permute.xlu1 %1501  ;;  %v1572_v11 = vpop.permute.xlu0 %1571 }
 0x696   :  { %v1617_v45 = vsel %vm1615_vm7, %v1607_v33, %v1572_v11  ;;  %v1598_v47 = vsel %vm378_vm1, %v3435_v9, %v1502_v24  ;;  %v2654_v24 = vld [vmem:[%s4024_s0 + $0x18] sm:$0xff] }
 0x697   :  { %2333 = vmatmul.msk.f32.gmra.mxu2 %vm36_vm0, %v1617_v45  ;;  %v1608_v17 = vsel %vm1605_vm6, %v1598_v47, %v1538_v53 }
 0x69d   :  { %v1504_v15 = vpop.permute.xlu1 %1503  ;;  %v1574_v3 = vpop.permute.xlu0 %1573 }
 0x69e   :  { %v1618_v18 = vsel %vm1615_vm7, %v1608_v17, %v1574_v3  ;;  %v1599_v39 = vsel %vm378_vm1, %v3439_v23, %v1504_v15  ;;  %v2655_v15 = vld [vmem:[%s4024_s0 + $0x20] sm:$0xff] }
 0x69f   :  { %2334 = vmatmul.msk.f32.gmra.mxu2 %vm36_vm0, %v1618_v18 }
 0x6a4   :  { %v1540_v56 = vpop.permute.xlu2 %1539 }
 0x6a5   :  { %v1609_v29 = vsel %vm1605_vm6, %v1599_v39, %v1540_v56  ;;  %v1506_v0 = vpop.permute.xlu1 %1505  ;;  %v1576_v21 = vpop.permute.xlu0 %1575  ;;  %v2656_v56 = vld [vmem:[%s4024_s0 + $0x28] sm:$0xff] }
 0x6a6   :  { %v1619_v14 = vsel %vm1615_vm7, %v1609_v29, %v1576_v21  ;;  %v1600_v9 = vsel %vm378_vm1, %v3444_v12, %v1506_v0 }
 0x6a7   :  { %2335 = vmatmul.msk.f32.gmra.mxu2 %vm36_vm0, %v1619_v14 }
 0x6ac   :  { %v1542_v55 = vpop.permute.xlu2 %1541 }
 0x6ad   :  { %v1610_v43 = vsel %vm1605_vm6, %v1600_v9, %v1542_v55  ;;  %v1508_v8 = vpop.permute.xlu1 %1507  ;;  %v1578_v30 = vpop.permute.xlu0 %1577  ;;  %v2657_v9 = vld [vmem:[%s4024_s0 + $0x30] sm:$0xff] }
 0x6ae   :  { %v1620_v44 = vsel %vm1615_vm7, %v1610_v43, %v1578_v30  ;;  %v1601_v23 = vsel %vm378_vm1, %v3449_v27, %v1508_v8 }
 0x6af   :  { %2336 = vmatmul.msk.f32.gmra.mxu2 %vm36_vm0, %v1620_v44 }
 0x6b4   :  { %v1544_v49 = vpop.permute.xlu2 %1543 }
 0x6b5   :  { %v1611_v25 = vsel %vm1605_vm6, %v1601_v23, %v1544_v49  ;;  %v1510_v54 = vpop.permute.xlu1 %1509  ;;  %v1580_v51 = vpop.permute.xlu0 %1579  ;;  %v2658_v23 = vld [vmem:[%s4024_s0 + $0x40] sm:$0xf] }
 0x6b6   :  { %v1621_v19 = vsel %vm1615_vm7, %v1611_v25, %v1580_v51  ;;  %v1602_v12 = vsel %vm378_vm1, %v3459_v13, %v1510_v54 }
 0x6b7   :  { %2337 = vmatmul.msk.f32.gmra.mxu2 %vm36_vm0, %v1621_v19 }
 0x6bc   :  { %v1546_v46 = vpop.permute.xlu2 %1545 }
 0x6bd   :  { %v1612_v4 = vsel %vm1605_vm6, %v1602_v12, %v1546_v46  ;;  %v1582_v62 = vpop.permute.xlu0 %1581  ;;  %v1512_v2 = vpop.permute.xlu1 %1511 }
 0x6be   :  { %v1622_v48 = vsel %vm1615_vm7, %v1612_v4, %v1582_v62  ;;  %v1603_v27 = vsel %vm378_vm1, %v3466_v6, %v1512_v2  ;;  %v3713_v6 = vld [vmem:[%s4025_s1] sm:$0xf]  ;;  %v2659_v4 = vld [vmem:[%s4024_s0 + $0x38] sm:$0xff] }
 0x6bf   :  { %2338 = vmatmul.msk.f32.gmra.mxu2 %vm36_vm0, %v1622_v48  ;;  %v3716_v52 = vperm.slane %v3713_v6, 1 }
 0x6c4   :  { %v1548_v61 = vpop.permute.xlu2 %1547 }
 0x6c5   :  { %v1613_v50 = vsel %vm1605_vm6, %v1603_v27, %v1548_v61  ;;  %v1584_v28 = vpop.permute.xlu0 %1583  ;;  %v1514_v13 = vpop.permute.xlu1 %1513 }
 0x6c6   :  { %v1623_v34 = vsel %vm1615_vm7, %v1613_v50, %v1584_v28  ;;  %v1604_v42 = vsel %vm378_vm1, %v3470_v35, %v1514_v13  ;;  %v2651_v35 = vld [vmem:[%s4024_s0] sm:$0xff]  ;;  %s2675_s0 = smov 32  }
 0x6c7   :  { %2339 = vmatmul.msk.f32.gmra.mxu2 %vm36_vm0, %v1623_v34 }
 0x6cc   :  { %v1550_v60 = vpop.permute.xlu2 %1549 }
 0x6cd   :  { %v1614_v36 = vsel %vm1605_vm6, %v1604_v42, %v1550_v60  ;;  %v1586_v58 = vpop.permute.xlu0 %1585 }
 0x6ce   :  { %v1624_v40 = vsel %vm1615_vm7, %v1614_v36, %v1586_v58 }
 0x6cf   :  { %2340 = vmatmul.msk.f32.gmra.mxu2 %vm36_vm0, %v1624_v40 }
 0x712   :  { %v1673_v10 = vpop.f32.mrf.mxu2 }
 0x713   :  { %v1700_v16 = vadd.f32 %v2651_v35, %v1673_v10 }
 0x715   :  { %v3722_v57 = vadd.f32 %v3716_v52, %v1700_v16 }
 0x717   :  { %v1719_v22 = vsel %vm36_vm0, %v3722_v57, 0.0 }
 0x718   :  { %1720 = vadd.xlane.f32.xlu1 %v1719_v22 }
 0x71a   :  { %v1676_v63 = vpop.f32.mrf.mxu2 }
 0x71b   :  { %v1701_v26 = vadd.f32 %v2652_v37, %v1676_v63 }
 0x71d   :  { %v3730_v38 = vadd.f32 %v3716_v52, %v1701_v26 }
 0x71f   :  { %v1722_v41 = vsel %vm36_vm0, %v3730_v38, 0.0 }
 0x720   :  { %1723 = vadd.xlane.f32.xlu2 %v1722_v41 }
 0x722   :  { %v1679_v32 = vpop.f32.mrf.mxu2 }
 0x723   :  { %v1702_v1 = vadd.f32 %v2653_v5, %v1679_v32 }
 0x725   :  { %v3738_v7 = vadd.f32 %v3716_v52, %v1702_v1 }
 0x727   :  { %v1725_v31 = vsel %vm36_vm0, %v3738_v7, 0.0 }
 0x728   :  { %1726 = vadd.xlane.f32.xlu0 %v1725_v31 }
 0x72a   :  { %v1682_v33 = vpop.f32.mrf.mxu2 }
 0x72b   :  { %v1703_v11 = vadd.f32 %v2654_v24, %v1682_v33 }
 0x72d   :  { %v3746_v45 = vadd.f32 %v3716_v52, %v1703_v11 }
 0x72f   :  { %v1728_v47 = vsel %vm36_vm0, %v3746_v45, 0.0 }
 0x730   :  { %1729 = vadd.xlane.f32.xlu1 %v1728_v47 }
 0x732   :  { %v1685_v53 = vpop.f32.mrf.mxu2 }
 0x733   :  { %v1704_v3 = vadd.f32 %v2655_v15, %v1685_v53 }
 0x735   :  { %v3754_v17 = vadd.f32 %v3716_v52, %v1704_v3 }
 0x737   :  { %v1731_v18 = vsel %vm36_vm0, %v3754_v17, 0.0 }
 0x738   :  { %1732 = vadd.xlane.f32.xlu2 %v1731_v18 }
 0x73a   :  { %v1688_v39 = vpop.f32.mrf.mxu2 }
 0x73b   :  { %v1705_v29 = vadd.f32 %v2656_v56, %v1688_v39 }
 0x73d   :  { %v3762_v0 = vadd.f32 %v3716_v52, %v1705_v29 }
 0x73f   :  { %v1734_v21 = vsel %vm36_vm0, %v3762_v0, 0.0 }
 0x740   :  { %1735 = vadd.xlane.f32.xlu0 %v1734_v21 }
 0x742   :  { %v1691_v14 = vpop.f32.mrf.mxu2 }
 0x743   :  { %v1706_v55 = vadd.f32 %v2657_v9, %v1691_v14  ;;  %v1944_v14 = vld [vmem:[%s4029_s5 + $0x18] sm:$0xff]  ;;  %v1943_v9 = vld [vmem:[%s4029_s5 + $0x10] sm:$0xff] }
 0x744   :  { %1985 = vmatpush.msrb.mxu0 %v1944_v14  ;;  %2350 = vmatpush.msra.mxu1 %v1944_v14 }
 0x745   :  { %v3770_v43 = vadd.f32 %v3716_v52, %v1706_v55  ;;  %v1942_v55 = vld [vmem:[%s4029_s5 + $0x8] sm:$0xff] }
 0x746   :  { %1986 = vmatpush.msrb.mxu0 %v1943_v9  ;;  %2351 = vmatpush.msra.mxu1 %v1943_v9 }
 0x747   :  { %v1737_v8 = vsel %vm36_vm0, %v3770_v43, 0.0 }
 0x748   :  { %1738 = vadd.xlane.f32.xlu2 %v1737_v8  ;;  %1987 = vmatpush.msrb.mxu0 %v1942_v55  ;;  %v1941_v8 = vld [vmem:[%s4029_s5] sm:$0xff] }
 0x749   :  { %2352 = vmatpush.msra.mxu1 %v1942_v55 }
 0x74a   :  { %v1694_v30 = vpop.f32.mrf.mxu2  ;;  %1988 = vmatpush.msrb.mxu0 %v1941_v8 }
 0x74b   :  { %v1707_v62 = vadd.f32 %v2659_v4, %v1694_v30  ;;  %2353 = vmatpush.msra.mxu1 %v1941_v8 }
 0x74d   :  { %v3794_v61 = vadd.f32 %v3716_v52, %v1707_v62 }
 0x74f   :  { %v1740_v34 = vsel %vm36_vm0, %v3794_v61, 0.0 }
 0x752   :  { %v1697_v44 = vpop.f32.mrf.mxu2 }
 0x753   :  { %v1708_v49 = vadd.f32 %v2658_v23, %v1697_v44 }
 0x755   :  { %v3778_v25 = vadd.f32 %v3716_v52, %v1708_v49 }
 0x757   :  { %v1743_v54 = vsel %vm61_vm2, %v3778_v25, 0.0 }
 0x758   :  { %1744 = vadd.xlane.f32.xlu0 %v1743_v54 }
 0x78b   :  { %v1721_v51 = vpop.xlane.xlu1 %1720 }
 0x78c   :  { %v1746_v19 = vmul.f32 %v1721_v51, %v2744_v20 }
 0x78e   :  { %v3784_v12 = vsub.f32 %v3722_v57, %v1746_v19 }
 0x790   :  { %v1764_v46 = vmul.f32 %v3784_v12, %v3784_v12 }
 0x792   :  { %v1773_v48 = vsel %vm36_vm0, %v1764_v46, 0.0 }
 0x793   :  { %v1724_v2 = vpop.xlane.xlu2 %1723  ;;  %1774 = vadd.xlane.f32.xlu1 %v1773_v48 }
 0x794   :  { %v1747_v27 = vmul.f32 %v1724_v2, %v2744_v20 }
 0x796   :  { %v3797_v50 = vsub.f32 %v3730_v38, %v1747_v27 }
 0x798   :  { %v1765_v28 = vmul.f32 %v3797_v50, %v3797_v50 }
 0x79a   :  { %v1776_v13 = vsel %vm36_vm0, %v1765_v28, 0.0 }
 0x79b   :  { %1741 = vadd.xlane.f32.xlu1 %v1740_v34  ;;  %1777 = vadd.xlane.f32.xlu0 %v1776_v13  ;;  %v1727_v42 = vpop.xlane.xlu0 %1726 }
 0x79c   :  { %v1748_v60 = vmul.f32 %v1727_v42, %v2744_v20 }
 0x79e   :  { %v3806_v36 = vsub.f32 %v3738_v7, %v1748_v60 }
 0x7a0   :  { %v1766_v58 = vmul.f32 %v3806_v36, %v3806_v36 }
 0x7a2   :  { %v1779_v40 = vsel %vm36_vm0, %v1766_v58, 0.0 }
 0x7a3   :  { %v1730_v10 = vpop.xlane.xlu1 %1729  ;;  %1780 = vadd.xlane.f32.xlu2 %v1779_v40 }
 0x7a4   :  { %v1749_v35 = vmul.f32 %v1730_v10, %v2744_v20 }
 0x7a6   :  { %v3813_v16 = vsub.f32 %v3746_v45, %v1749_v35 }
 0x7a8   :  { %v1767_v22 = vmul.f32 %v3813_v16, %v3813_v16 }
 0x7aa   :  { %v1782_v63 = vsel %vm36_vm0, %v1767_v22, 0.0 }
 0x7ab   :  { %v1733_v37 = vpop.xlane.xlu2 %1732  ;;  %1783 = vadd.xlane.f32.xlu1 %v1782_v63 }
 0x7ac   :  { %v1750_v26 = vmul.f32 %v1733_v37, %v2744_v20 }
 0x7ae   :  { %v3820_v41 = vsub.f32 %v3754_v17, %v1750_v26 }
 0x7af   :  { %1929 = vrot.lane.b32.xlu0 %v2802_v59, %s2675_s0 }
 0x7b0   :  { %v1768_v32 = vmul.f32 %v3820_v41, %v3820_v41 }
 0x7b2   :  { %v1785_v5 = vsel %vm36_vm0, %v1768_v32, 0.0 }
 0x7b3   :  { %1786 = vadd.xlane.f32.xlu1 %v1785_v5  ;;  %v1736_v1 = vpop.xlane.xlu0 %1735 }
 0x7b4   :  { %v1751_v31 = vmul.f32 %v1736_v1, %v2744_v20 }
 0x7b6   :  { %v3828_v33 = vsub.f32 %v3762_v0, %v1751_v31 }
 0x7b8   :  { %v1769_v24 = vmul.f32 %v3828_v33, %v3828_v33 }
 0x7ba   :  { %v1788_v11 = vsel %vm36_vm0, %v1769_v24, 0.0 }
 0x7bb   :  { %1917 = vrot.lane.b32.xlu2 %v2802_v59, %s2663_s30  ;;  %1789 = vadd.xlane.f32.xlu1 %v1788_v11  ;;  %v1739_v47 = vpop.xlane.xlu2 %1738 }
 0x7bc   :  { %v1752_v53 = vmul.f32 %v1739_v47, %v2744_v20 }
 0x7be   :  { %v3837_v15 = vsub.f32 %v3770_v43, %v1752_v53 }
 0x7c0   :  { %v1770_v18 = vmul.f32 %v3837_v15, %v3837_v15 }
 0x7c2   :  { %v1791_v56 = vsel %vm36_vm0, %v1770_v18, 0.0 }
 0x7cb   :  { %v1745_v3 = vpop.xlane.xlu0 %1744 }
 0x7cc   :  { %v1754_v39 = vmul.f32 %v1745_v3, %v2744_v20 }
 0x7ce   :  { %v3844_v29 = vsub.f32 %v3778_v25, %v1754_v39 }
 0x7d0   :  { %v1772_v59 = vmul.f32 %v3844_v29, %v3844_v29 }
 0x7d2   :  { %v1797_v21 = vsel %vm61_vm2, %v1772_v59, 0.0 }
 0x7d9   :  { %1792 = vadd.xlane.f32.xlu0 %v1791_v56 }
 0x7e4   :  { %1798 = vadd.xlane.f32.xlu2 %v1797_v21 }
 0x806   :  { %v1775_v30 = vpop.xlane.xlu1 %1774 }
 0x807   :  { %v1800_v44 = vmul.f32 %v1775_v30, %v2744_v20 }
 0x809   :  { %v1809_v23 = vadd.f32 1e-05, %v1800_v44 }
 0x80b   :  { %2614 = vrsqrt.f32 %v1809_v23  ;;  %vm1824_vm9 = vweird.f32 %v1809_v23 }
 0x80e   :  { %v1742_v49 = vpop.xlane.xlu1 %1741  ;;  %v1778_v54 = vpop.xlane.xlu0 %1777 }
 0x80f   :  { %v1753_v51 = vmul.f32 %v1742_v49, %v2744_v20  ;;  %v1801_v19 = vmul.f32 %v1778_v54, %v2744_v20 }
 0x811   :  { %v2615_v46 = vpop.eup %2614  ;;  %v3865_v4 = vsub.f32 %v3794_v61, %v1753_v51  ;;  %v1810_v62 = vadd.f32 1e-05, %v1801_v19 }
 0x812   :  { %v1819_v48 = vmul.f32 %v2615_v46, %v1809_v23  ;;  %vm1825_vm8 = vweird.f32 %v2615_v46 }
 0x813   :  { %2616 = vrsqrt.f32 %v1810_v62  ;;  %v1771_v2 = vmul.f32 %v3865_v4, %v3865_v4  ;;  %vm1826_vm10 = vmor %vm1824_vm9, %vm1825_vm8  ;;  %vm1834_vm12 = vweird.f32 %v1810_v62 }
 0x814   :  { %v1820_v27 = vmul.f32 %v2615_v46, %v1819_v48 }
 0x815   :  { %v1794_v28 = vsel %vm36_vm0, %v1771_v2, 0.0 }
 0x816   :  { %v1821_v34 = vmul.f32 0.5, %v1820_v27  ;;  %v1781_v13 = vpop.xlane.xlu2 %1780  ;;  %1795 = vadd.xlane.f32.xlu1 %v1794_v28 }
 0x817   :  { %v1802_v42 = vmul.f32 %v1781_v13, %v2744_v20 }
 0x818   :  { %v1822_v60 = vsub.f32 1.5, %v1821_v34 }
 0x819   :  { %v2617_v58 = vpop.eup %2616  ;;  %v1811_v40 = vadd.f32 1e-05, %v1802_v42 }
 0x81a   :  { %v1823_v10 = vmul.f32 %v2615_v46, %v1822_v60  ;;  %v1829_v35 = vmul.f32 %v2617_v58, %v1810_v62  ;;  %vm1835_vm11 = vweird.f32 %v2617_v58 }
 0x81b   :  { %2618 = vrsqrt.f32 %v1811_v40  ;;  %vm1836_vm13 = vmor %vm1834_vm12, %vm1835_vm11  ;;  %vm1844_vm15 = vweird.f32 %v1811_v40 }
 0x81c   :  { %v1827_v22 = vsel %vm1826_vm10, %v2615_v46, %v1823_v10  ;;  %v1830_v63 = vmul.f32 %v2617_v58, %v1829_v35 }
 0x81d   :  { %v1908_v37 = vmul.f32 %v1827_v22, %v3784_v12 }
 0x81e   :  { %v1831_v26 = vmul.f32 0.5, %v1830_v63  ;;  %v1784_v32 = vpop.xlane.xlu1 %1783  ;;  %v3872_v5 = vpop.permute.xlu2 %1917 }
 0x81f   :  { %v1803_v1 = vmul.f32 %v1784_v32, %v2744_v20  ;;  %v1920_v31 = vmul.f32 %v3872_v5, %v1908_v37 }
 0x820   :  { %v1832_v24 = vsub.f32 1.5, %v1831_v26 }
 0x821   :  { %v2619_v11 = vpop.eup %2618  ;;  %v1812_v47 = vadd.f32 1e-05, %v1803_v1  ;;  %v3876_v53 = vpop.permute.xlu0 %1929 }
 0x822   :  { %v1833_v3 = vmul.f32 %v2617_v58, %v1832_v24  ;;  %v1839_v18 = vmul.f32 %v2619_v11, %v1811_v40  ;;  %v1932_v39 = vadd.f32 %v3876_v53, %v1920_v31  ;;  %vm1845_vm14 = vweird.f32 %v2619_v11 }
 0x823   :  { %2620 = vrsqrt.f32 %v1812_v47  ;;  %vm1846_vm1 = vmor %vm1844_vm15, %vm1845_vm14  ;;  %vm1854_vm4 = vweird.f32 %v1812_v47 }
 0x824   :  { %v1837_v12 = vsel %vm1836_vm13, %v2617_v58, %v1833_v3  ;;  %v1840_v56 = vmul.f32 %v2619_v11, %v1839_v18  ;;  %2341 = vmatmul.msk.f32.vlgmr.msrb.gmra.mxu0 %vm36_vm0, %v1932_v39 }
 0x825   :  { %v1909_v59 = vmul.f32 %v1837_v12, %v3797_v50 }
 0x826   :  { %v1841_v21 = vmul.f32 0.5, %v1840_v56  ;;  %v1787_v14 = vpop.xlane.xlu1 %1786 }
 0x827   :  { %v1804_v9 = vmul.f32 %v1787_v14, %v2744_v20  ;;  %v1921_v55 = vmul.f32 %v3872_v5, %v1909_v59 }
 0x828   :  { %v1842_v8 = vsub.f32 1.5, %v1841_v21 }
 0x829   :  { %v2621_v30 = vpop.eup %2620  ;;  %v1813_v44 = vadd.f32 1e-05, %v1804_v9  ;;  %v1933_v23 = vadd.f32 %v3876_v53, %v1921_v55 }
 0x82a   :  { %v1843_v49 = vmul.f32 %v2619_v11, %v1842_v8  ;;  %v1849_v54 = vmul.f32 %v2621_v30, %v1812_v47  ;;  %vm1855_vm3 = vweird.f32 %v2621_v30 }
 0x82b   :  { %2622 = vrsqrt.f32 %v1813_v44  ;;  %2342 = vmatmul.msk.f32.vlgmr.msra.gmra.mxu1 %vm36_vm0, %v1933_v23  ;;  %vm1856_vm5 = vmor %vm1854_vm4, %vm1855_vm3  ;;  %vm1864_vm7 = vweird.f32 %v1813_v44 }
 0x82c   :  { %v1847_v50 = vsel %vm1846_vm1, %v2619_v11, %v1843_v49  ;;  %v1850_v51 = vmul.f32 %v2621_v30, %v1849_v54 }
 0x82d   :  { %v1910_v19 = vmul.f32 %v1847_v50, %v3806_v36 }
 0x82e   :  { %v1851_v46 = vmul.f32 0.5, %v1850_v51  ;;  %v1790_v62 = vpop.xlane.xlu1 %1789 }
 0x82f   :  { %v1805_v48 = vmul.f32 %v1790_v62, %v2744_v20  ;;  %v1922_v2 = vmul.f32 %v3872_v5, %v1910_v19  ;;  %2115 = vrot.lane.b32.xlu1 %v3716_v52, %s2661_s21  ;;  %v2113_v19 = vld [vmem:[%s4030_s6 + $0x78] sm:$0xff]  ;;  %v2111_v62 = vld [vmem:[%s4030_s6 + $0x68] sm:$0xff] }
 0x830   :  { %v1852_v27 = vsub.f32 1.5, %v1851_v46  ;;  %2118 = vmatpush.msra.mxu3 %v2113_v19  ;;  %v2112_v46 = vld [vmem:[%s4030_s6 + $0x70] sm:$0xff] }
 0x831   :  { %v2623_v28 = vpop.eup %2622  ;;  %v1814_v34 = vadd.f32 1e-05, %v1805_v48  ;;  %v1934_v13 = vadd.f32 %v3876_v53, %v1922_v2  ;;  %v2110_v48 = vld [vmem:[%s4030_s6 + $0x60] sm:$0xff]  ;;  %v2109_v2 = vld [vmem:[%s4030_s6 + $0x58] sm:$0xff] }
 0x832   :  { %v1853_v42 = vmul.f32 %v2621_v30, %v1852_v27  ;;  %v1859_v60 = vmul.f32 %v2623_v28, %v1813_v44  ;;  %vm1865_vm6 = vweird.f32 %v2623_v28  ;;  %2119 = vmatpush.msra.mxu3 %v2112_v46  ;;  %v2108_v27 = vld [vmem:[%s4030_s6 + $0x50] sm:$0xff] }
 0x833   :  { %2624 = vrsqrt.f32 %v1814_v34  ;;  %2343 = vmatmul.msk.f32.gmra.mxu1 %vm36_vm0, %v1934_v13  ;;  %vm1866_vm8 = vmor %vm1864_vm7, %vm1865_vm6  ;;  %vm1874_vm10 = vweird.f32 %v1814_v34 }
 0x834   :  { %v1857_v36 = vsel %vm1856_vm5, %v2621_v30, %v1853_v42  ;;  %v1860_v58 = vmul.f32 %v2623_v28, %v1859_v60  ;;  %2120 = vmatpush.msra.mxu3 %v2111_v62  ;;  %v2106_v60 = vld [vmem:[%s4030_s6 + $0x40] sm:$0xff] }
 0x835   :  { %v1911_v40 = vmul.f32 %v1857_v36, %v3813_v16 }
 0x836   :  { %v1861_v10 = vmul.f32 0.5, %v1860_v58  ;;  %2121 = vmatpush.msra.mxu3 %v2110_v48  ;;  %v2105_v58 = vld [vmem:[%s4030_s6 + $0x38] sm:$0xff] }
 0x837   :  { %v1923_v52 = vmul.f32 %v3872_v5, %v1911_v40 }
 0x838   :  { %v1862_v35 = vsub.f32 1.5, %v1861_v10  ;;  %2122 = vmatpush.msra.mxu3 %v2109_v2  ;;  %v2104_v10 = vld [vmem:[%s4030_s6 + $0x30] sm:$0xff] }
 0x839   :  { %v2625_v22 = vpop.eup %2624  ;;  %v1935_v63 = vadd.f32 %v3876_v53, %v1923_v52 }
 0x83a   :  { %v1863_v37 = vmul.f32 %v2623_v28, %v1862_v35  ;;  %v1869_v26 = vmul.f32 %v2625_v22, %v1814_v34  ;;  %vm1875_vm9 = vweird.f32 %v2625_v22  ;;  %2123 = vmatpush.msra.mxu3 %v2108_v27  ;;  %v2102_v35 = vld [vmem:[%s4030_s6 + $0x20] sm:$0xff] }
 0x83b   :  { %2344 = vmatmul.msk.f32.gmra.mxu1 %vm36_vm0, %v1935_v63  ;;  %vm1876_vm11 = vmor %vm1874_vm10, %vm1875_vm9  ;;  %v2101_v63 = vld [vmem:[%s4030_s6 + $0x18] sm:$0xff] }
 0x83c   :  { %v1867_v32 = vsel %vm1866_vm8, %v2623_v28, %v1863_v37  ;;  %v1870_v1 = vmul.f32 %v2625_v22, %v1869_v26  ;;  %v2107_v28 = vld [vmem:[%s4030_s6 + $0x48] sm:$0xff] }
 0x83d   :  { %v1912_v31 = vmul.f32 %v1867_v32, %v3820_v41  ;;  %2124 = vmatpush.msra.mxu3 %v2107_v28  ;;  %v2100_v32 = vld [vmem:[%s4030_s6 + $0x10] sm:$0xff] }
 0x83e   :  { %v1871_v24 = vmul.f32 0.5, %v1870_v1 }
 0x83f   :  { %v1924_v16 = vmul.f32 %v3872_v5, %v1912_v31  ;;  %2125 = vmatpush.msra.mxu3 %v2106_v60  ;;  %v2099_v31 = vld [vmem:[%s4030_s6 + $0x8] sm:$0xff] }
 0x840   :  { %v1872_v11 = vsub.f32 1.5, %v1871_v24 }
 0x841   :  { %v1936_v47 = vadd.f32 %v3876_v53, %v1924_v16  ;;  %2126 = vmatpush.msra.mxu3 %v2105_v58 }
 0x842   :  { %v1873_v3 = vmul.f32 %v2625_v22, %v1872_v11  ;;  %v2098_v11 = vld [vmem:[%s4030_s6] sm:$0xff] }
 0x843   :  { %2345 = vmatmul.msk.f32.gmra.mxu1 %vm36_vm0, %v1936_v47  ;;  %2127 = vmatpush.msra.mxu3 %v2104_v10 }
 0x844   :  { %v1877_v18 = vsel %vm1876_vm11, %v2625_v22, %v1873_v3 }
 0x845   :  { %v1913_v39 = vmul.f32 %v1877_v18, %v3828_v33 }
 0x847   :  { %v1925_v12 = vmul.f32 %v3872_v5, %v1913_v39  ;;  %v3960_v39 = vperm.slane %v3713_v6, 3 }
 0x849   :  { %v1937_v56 = vadd.f32 %v3876_v53, %v1925_v12 }
 0x84b   :  { %2346 = vmatmul.msk.f32.gmra.mxu1 %vm36_vm0, %v1937_v56 }
 0x84c   :  { %v1793_v41 = vpop.xlane.xlu0 %1792 }
 0x84d   :  { %v1806_v59 = vmul.f32 %v1793_v41, %v2744_v20 }
 0x84f   :  { %v1815_v21 = vadd.f32 1e-05, %v1806_v59 }
 0x851   :  { %2626 = vrsqrt.f32 %v1815_v21  ;;  %vm1884_vm13 = vweird.f32 %v1815_v21 }
 0x857   :  { %v2627_v14 = vpop.eup %2626  ;;  %v1799_v50 = vpop.xlane.xlu2 %1798 }
 0x858   :  { %v1879_v9 = vmul.f32 %v2627_v14, %v1815_v21  ;;  %vm1885_vm12 = vweird.f32 %v2627_v14  ;;  %v1808_v51 = vmul.f32 %v1799_v50, %v2744_v20 }
 0x859   :  { %vm1886_vm14 = vmor %vm1884_vm13, %vm1885_vm12 }
 0x85a   :  { %v1880_v55 = vmul.f32 %v2627_v14, %v1879_v9 }
 0x85c   :  { %v1881_v8 = vmul.f32 0.5, %v1880_v55 }
 0x85e   :  { %v1882_v30 = vsub.f32 1.5, %v1881_v8 }
 0x860   :  { %v1883_v44 = vmul.f32 %v2627_v14, %v1882_v30 }
 0x862   :  { %v1887_v33 = vsel %vm1886_vm14, %v2627_v14, %v1883_v44 }
 0x863   :  { %v1914_v23 = vmul.f32 %v1887_v33, %v3837_v15  ;;  %v1817_v15 = vadd.f32 1e-05, %v1808_v51 }
 0x865   :  { %v1926_v49 = vmul.f32 %v3872_v5, %v1914_v23  ;;  %2628 = vrsqrt.f32 %v1817_v15  ;;  %vm1904_vm5 = vweird.f32 %v1817_v15 }
 0x867   :  { %v1938_v54 = vadd.f32 %v3876_v53, %v1926_v49 }
 0x869   :  { %2347 = vmatmul.msk.f32.gmra.mxu1 %vm36_vm0, %v1938_v54 }
 0x86b   :  { %v2629_v13 = vpop.eup %2628 }
 0x86c   :  { %v1899_v40 = vmul.f32 %v2629_v13, %v1817_v15  ;;  %vm1905_vm1 = vweird.f32 %v2629_v13 }
 0x86d   :  { %vm1906_vm6 = vmor %vm1904_vm5, %vm1905_vm1 }
 0x86e   :  { %v1900_v52 = vmul.f32 %v2629_v13, %v1899_v40 }
 0x870   :  { %v1901_v37 = vmul.f32 0.5, %v1900_v52 }
 0x872   :  { %v1902_v24 = vsub.f32 1.5, %v1901_v37 }
 0x874   :  { %v1903_v3 = vmul.f32 %v2629_v13, %v1902_v24 }
 0x876   :  { %v1907_v41 = vsel %vm1906_vm6, %v2629_v13, %v1903_v3 }
 0x877   :  { %v1916_v9 = vmul.f32 %v1907_v41, %v3844_v29 }
 0x879   :  { %v1928_v33 = vmul.f32 %v3872_v5, %v1916_v9 }
 0x87b   :  { %v1940_v50 = vadd.f32 %v3876_v53, %v1928_v33 }
 0x889   :  { %v1796_v34 = vpop.xlane.xlu1 %1795 }
 0x88a   :  { %v1807_v42 = vmul.f32 %v1796_v34, %v2744_v20  ;;  %v2103_v20 = vld [vmem:[%s4030_s6 + $0x28] sm:$0xff] }
 0x88b   :  { %2128 = vmatpush.msra.mxu3 %v2103_v20 }
 0x88c   :  { %v1816_v36 = vadd.f32 1e-05, %v1807_v42 }
 0x88d   :  { %2129 = vmatpush.msra.mxu3 %v2102_v35 }
 0x88e   :  { %2630 = vrsqrt.f32 %v1816_v36  ;;  %vm1894_vm3 = vweird.f32 %v1816_v36 }
 0x88f   :  { %2130 = vmatpush.msra.mxu3 %v2101_v63 }
 0x891   :  { %2131 = vmatpush.msra.mxu3 %v2100_v32 }
 0x893   :  { %2132 = vmatpush.msra.mxu3 %v2099_v31 }
 0x894   :  { %v2631_v22 = vpop.eup %2630 }
 0x895   :  { %v1889_v26 = vmul.f32 %v2631_v22, %v1816_v36  ;;  %vm1895_vm15 = vweird.f32 %v2631_v22  ;;  %2133 = vmatpush.msra.mxu3 %v2098_v11 }
 0x896   :  { %vm1896_vm4 = vmor %vm1894_vm3, %vm1895_vm15 }
 0x897   :  { %v1890_v1 = vmul.f32 %v2631_v22, %v1889_v26 }
 0x899   :  { %v1891_v16 = vmul.f32 0.5, %v1890_v1 }
 0x89b   :  { %v1892_v47 = vsub.f32 1.5, %v1891_v16 }
 0x89d   :  { %v1893_v18 = vmul.f32 %v2631_v22, %v1892_v47 }
 0x89f   :  { %v1897_v12 = vsel %vm1896_vm4, %v2631_v22, %v1893_v18 }
 0x8a0   :  { %v1915_v56 = vmul.f32 %v1897_v12, %v3865_v4 }
 0x8a1   :  { %v1990_v59 = vpop.f32.mrf.mxu0 }
 0x8a2   :  { %v1991_v21 = vadd.f32 %v1990_v59, %v3960_v39  ;;  %v1927_v14 = vmul.f32 %v3872_v5, %v1915_v56 }
 0x8a4   :  { %v2017_v55 = vmul.f32 %v1991_v21, %v1991_v21  ;;  %v1939_v8 = vadd.f32 %v3876_v53, %v1927_v14 }
 0x8a6   :  { %v2026_v30 = vmul.f32 %v2017_v55, %v1991_v21  ;;  %2348 = vmatmul.msk.f32.gmra.mxu1 %vm36_vm0, %v1939_v8 }
 0x8a8   :  { %v2035_v6 = vmul.f32 0.044715, %v2026_v30  ;;  %v1993_v44 = vpop.f32.mrf.mxu1 }
 0x8a9   :  { %v1994_v4 = vadd.f32 %v1993_v44, %v3960_v39 }
 0x8aa   :  { %v2044_v23 = vadd.f32 %v2035_v6, %v1991_v21 }
 0x8ab   :  { %v2018_v49 = vmul.f32 %v1994_v4, %v1994_v4 }
 0x8ac   :  { %v2053_v54 = vmul.f32 0.7978846, %v2044_v23 }
 0x8ad   :  { %v2027_v51 = vmul.f32 %v2018_v49, %v1994_v4 }
 0x8ae   :  { %2632 = vtanh.f32 %v2053_v54  ;;  %2349 = vmatmul.msk.f32.gmra.mxu1 %vm36_vm0, %v1940_v50 }
 0x8af   :  { %v2036_v29 = vmul.f32 0.044715, %v2027_v51 }
 0x8b0   :  { %v1996_v19 = vpop.f32.mrf.mxu1 }
 0x8b1   :  { %v1997_v46 = vadd.f32 %v1996_v19, %v3960_v39  ;;  %v2045_v15 = vadd.f32 %v2036_v29, %v1994_v4 }
 0x8b3   :  { %v2019_v62 = vmul.f32 %v1997_v46, %v1997_v46  ;;  %v2054_v48 = vmul.f32 0.7978846, %v2045_v15 }
 0x8b4   :  { %v2633_v2 = vpop.eup %2632 }
 0x8b5   :  { %v2028_v5 = vmul.f32 %v2019_v62, %v1997_v46  ;;  %v2071_v27 = vadd.f32 1.0, %v2633_v2  ;;  %2634 = vtanh.f32 %v2054_v48 }
 0x8b7   :  { %v2080_v28 = vmul.f32 0.5, %v2071_v27  ;;  %v2037_v34 = vmul.f32 0.044715, %v2028_v5 }
 0x8b8   :  { %v1999_v13 = vpop.f32.mrf.mxu1 }
 0x8b9   :  { %v2000_v53 = vadd.f32 %v1999_v13, %v3960_v39  ;;  %v2089_v42 = vmul.f32 %v2080_v28, %v1991_v21  ;;  %v2046_v60 = vadd.f32 %v2037_v34, %v1997_v46 }
 0x8bb   :  { %v2635_v36 = vpop.eup %2634  ;;  %v2020_v58 = vmul.f32 %v2000_v53, %v2000_v53  ;;  %2134 = vmatmul.f32.vlgmr.msra.gmra.mxu3 %v2089_v42  ;;  %v2055_v40 = vmul.f32 0.7978846, %v2046_v60 }
 0x8bc   :  { %v2072_v10 = vadd.f32 1.0, %v2635_v36 }
 0x8bd   :  { %v2029_v20 = vmul.f32 %v2020_v58, %v2000_v53  ;;  %2636 = vtanh.f32 %v2055_v40 }
 0x8be   :  { %v2081_v52 = vmul.f32 0.5, %v2072_v10 }
 0x8bf   :  { %v2038_v35 = vmul.f32 0.044715, %v2029_v20 }
 0x8c0   :  { %v2002_v22 = vpop.f32.mrf.mxu1  ;;  %v2090_v63 = vmul.f32 %v2081_v52, %v1994_v4 }
 0x8c1   :  { %v2003_v37 = vadd.f32 %v2002_v22, %v3960_v39  ;;  %v2047_v26 = vadd.f32 %v2038_v35, %v2000_v53 }
 0x8c3   :  { %v2637_v32 = vpop.eup %2636  ;;  %v2021_v1 = vmul.f32 %v2003_v37, %v2003_v37  ;;  %2137 = vmatmul.f32.gmra.mxu3 %v2090_v63  ;;  %v2056_v31 = vmul.f32 0.7978846, %v2047_v26 }
 0x8c4   :  { %v2073_v24 = vadd.f32 1.0, %v2637_v32 }
 0x8c5   :  { %v2030_v16 = vmul.f32 %v2021_v1, %v2003_v37  ;;  %2638 = vtanh.f32 %v2056_v31 }
 0x8c6   :  { %v2082_v11 = vmul.f32 0.5, %v2073_v24 }
 0x8c7   :  { %v2039_v47 = vmul.f32 0.044715, %v2030_v16  ;;  %v2116_v16 = vpop.permute.xlu1 %2115 }
 0x8c8   :  { %v2005_v3 = vpop.f32.mrf.mxu1  ;;  %v2091_v18 = vmul.f32 %v2082_v11, %v1997_v46 }
 0x8c9   :  { %v2006_v12 = vadd.f32 %v2005_v3, %v3960_v39  ;;  %v2048_v56 = vadd.f32 %v2039_v47, %v2003_v37 }
 0x8cb   :  { %v2639_v41 = vpop.eup %2638  ;;  %v2022_v59 = vmul.f32 %v2006_v12, %v2006_v12  ;;  %2140 = vmatmul.f32.gmra.mxu3 %v2091_v18  ;;  %v2057_v21 = vmul.f32 0.7978846, %v2048_v56 }
 0x8cc   :  { %v2074_v14 = vadd.f32 1.0, %v2639_v41 }
 0x8cd   :  { %v2031_v9 = vmul.f32 %v2022_v59, %v2006_v12  ;;  %2640 = vtanh.f32 %v2057_v21 }
 0x8ce   :  { %v2083_v55 = vmul.f32 0.5, %v2074_v14 }
 0x8cf   :  { %v2040_v8 = vmul.f32 0.044715, %v2031_v9 }
 0x8d0   :  { %v2092_v30 = vmul.f32 %v2083_v55, %v2000_v53 }
 0x8d1   :  { %v2049_v6 = vadd.f32 %v2040_v8, %v2006_v12 }
 0x8d3   :  { %v2641_v44 = vpop.eup %2640  ;;  %2143 = vmatmul.f32.gmra.mxu3 %v2092_v30  ;;  %v2058_v33 = vmul.f32 0.7978846, %v2049_v6 }
 0x8d4   :  { %v2075_v4 = vadd.f32 1.0, %v2641_v44 }
 0x8d5   :  { %2642 = vtanh.f32 %v2058_v33 }
 0x8d6   :  { %v2084_v23 = vmul.f32 0.5, %v2075_v4 }
 0x8d8   :  { %v2093_v49 = vmul.f32 %v2084_v23, %v2003_v37 }
 0x8db   :  { %v2643_v54 = vpop.eup %2642  ;;  %2146 = vmatmul.f32.gmra.mxu3 %v2093_v49 }
 0x8dc   :  { %v2076_v50 = vadd.f32 1.0, %v2643_v54 }
 0x8de   :  { %v2085_v51 = vmul.f32 0.5, %v2076_v50 }
 0x8e0   :  { %v2094_v29 = vmul.f32 %v2085_v51, %v2006_v12 }
 0x8e3   :  { %2149 = vmatmul.f32.gmra.mxu3 %v2094_v29 }
 0x8e6   :  { %v2008_v19 = vpop.f32.mrf.mxu1 }
 0x8e7   :  { %v2009_v46 = vadd.f32 %v2008_v19, %v3960_v39 }
 0x8e9   :  { %v2023_v15 = vmul.f32 %v2009_v46, %v2009_v46 }
 0x8eb   :  { %v2032_v62 = vmul.f32 %v2023_v15, %v2009_v46 }
 0x8ed   :  { %v2041_v48 = vmul.f32 0.044715, %v2032_v62 }
 0x8ef   :  { %v2050_v2 = vadd.f32 %v2041_v48, %v2009_v46 }
 0x8f1   :  { %v2059_v5 = vmul.f32 0.7978846, %v2050_v2 }
 0x8f3   :  { %2644 = vtanh.f32 %v2059_v5 }
 0x8f9   :  { %v2645_v27 = vpop.eup %2644 }
 0x8fa   :  { %v2077_v28 = vadd.f32 1.0, %v2645_v27 }
 0x8fc   :  { %v2086_v34 = vmul.f32 0.5, %v2077_v28 }
 0x8fe   :  { %v2095_v13 = vmul.f32 %v2086_v34, %v2009_v46 }
 0x900   :  { %2152 = vmatmul.f32.gmra.mxu3 %v2095_v13 }
 0x923   :  { %v2011_v53 = vpop.f32.mrf.mxu1 }
 0x924   :  { %v2012_v42 = vadd.f32 %v2011_v53, %v3960_v39 }
 0x926   :  { %v2024_v60 = vmul.f32 %v2012_v42, %v2012_v42 }
 0x928   :  { %v2033_v36 = vmul.f32 %v2024_v60, %v2012_v42 }
 0x92a   :  { %v2042_v58 = vmul.f32 0.044715, %v2033_v36 }
 0x92b   :  { %v2014_v40 = vpop.f32.mrf.mxu1 }
 0x92c   :  { %v2051_v10 = vadd.f32 %v2042_v58, %v2012_v42  ;;  %v2015_v20 = vadd.f32 %v2014_v40, %v3960_v39 }
 0x92e   :  { %v2025_v52 = vmul.f32 %v2015_v20, %v2015_v20  ;;  %v2060_v35 = vmul.f32 0.7978846, %v2051_v10 }
 0x930   :  { %v2034_v22 = vmul.f32 %v2025_v52, %v2015_v20  ;;  %2646 = vtanh.f32 %v2060_v35 }
 0x932   :  { %v2043_v63 = vmul.f32 0.044715, %v2034_v22 }
 0x934   :  { %v2052_v37 = vadd.f32 %v2043_v63, %v2015_v20 }
 0x936   :  { %v2647_v26 = vpop.eup %2646  ;;  %v2061_v32 = vmul.f32 0.7978846, %v2052_v37 }
 0x937   :  { %v2078_v1 = vadd.f32 1.0, %v2647_v26 }
 0x938   :  { %2648 = vtanh.f32 %v2061_v32 }
 0x939   :  { %v2087_v31 = vmul.f32 0.5, %v2078_v1 }
 0x93b   :  { %v2096_v24 = vmul.f32 %v2087_v31, %v2012_v42 }
 0x93d   :  { %2155 = vmatmul.f32.gmra.mxu3 %v2096_v24 }
 0x93e   :  { %v2649_v11 = vpop.eup %2648  ;;  %v2135_v47 = vpop.f32.mrf.mxu3 }
 0x93f   :  { %v2136_v3 = vadd.f32 %v2135_v47, %v2116_v16  ;;  %v2079_v18 = vadd.f32 1.0, %v2649_v11 }
 0x941   :  { %v2162_v39 = vadd.f32 %v2136_v3, %v3722_v57  ;;  %v2088_v12 = vmul.f32 0.5, %v2079_v18 }
 0x943   :  { %2171 = vst.msk [vmem:[%s4031_s7] sm:$0xff] %vm36_vm0, %v2162_v39  ;;  %v2097_v56 = vmul.f32 %v2088_v12, %v2015_v20 }
 0x945   :  { %2158 = vmatmul.f32.gmra.mxu3 %v2097_v56 }
 0x946   :  { %v2138_v41 = vpop.f32.mrf.mxu3 }
 0x947   :  { %v2139_v59 = vadd.f32 %v2138_v41, %v2116_v16 }
 0x949   :  { %v2163_v21 = vadd.f32 %v2139_v59, %v3730_v38 }
 0x94b   :  { %2172 = vst.msk [vmem:[%s4031_s7 + $0x8] sm:$0xff] %vm36_vm0, %v2163_v21 }
 0x94e   :  { %v2141_v14 = vpop.f32.mrf.mxu3 }
 0x94f   :  { %v2142_v9 = vadd.f32 %v2141_v14, %v2116_v16 }
 0x951   :  { %v2164_v57 = vadd.f32 %v2142_v9, %v3738_v7 }
 0x953   :  { %2173 = vst.msk [vmem:[%s4031_s7 + $0x10] sm:$0xff] %vm36_vm0, %v2164_v57 }
 0x956   :  { %v2144_v55 = vpop.f32.mrf.mxu3 }
 0x957   :  { %v2145_v8 = vadd.f32 %v2144_v55, %v2116_v16 }
 0x959   :  { %v2165_v30 = vadd.f32 %v2145_v8, %v3746_v45 }
 0x95b   :  { %2174 = vst.msk [vmem:[%s4031_s7 + $0x18] sm:$0xff] %vm36_vm0, %v2165_v30 }
 0x95e   :  { %v2147_v38 = vpop.f32.mrf.mxu3 }
 0x95f   :  { %v2148_v6 = vadd.f32 %v2147_v38, %v2116_v16 }
 0x961   :  { %v2166_v44 = vadd.f32 %v2148_v6, %v3754_v17 }
 0x963   :  { %2175 = vst.msk [vmem:[%s4031_s7 + $0x20] sm:$0xff] %vm36_vm0, %v2166_v44 }
 0x966   :  { %v2150_v7 = vpop.f32.mrf.mxu3 }
 0x967   :  { %v2151_v33 = vadd.f32 %v2150_v7, %v2116_v16 }
 0x969   :  { %v2167_v4 = vadd.f32 %v2151_v33, %v3762_v0 }
 0x96b   :  { %2176 = vst.msk [vmem:[%s4031_s7 + $0x28] sm:$0xff] %vm36_vm0, %v2167_v4 }
 0x983   :  { %v2153_v45 = vpop.f32.mrf.mxu3 }
 0x984   :  { %v2154_v23 = vadd.f32 %v2153_v45, %v2116_v16 }
 0x986   :  { %v2168_v49 = vadd.f32 %v2154_v23, %v3770_v43 }
 0x988   :  { %2177 = vst.msk [vmem:[%s4031_s7 + $0x30] sm:$0xff] %vm36_vm0, %v2168_v49 }
 0x9c0   :  { %v2156_v17 = vpop.f32.mrf.mxu3 }
 0x9c1   :  { %v2157_v54 = vadd.f32 %v2156_v17, %v2116_v16 }
 0x9c3   :  { %v2169_v50 = vadd.f32 %v2157_v54, %v3794_v61 }
 0x9c5   :  { %2178 = vst.msk [vmem:[%s4031_s7 + $0x38] sm:$0xff] %vm36_vm0, %v2169_v50 }
 0x9c8   :  { %v2159_v0 = vpop.f32.mrf.mxu3 }
 0x9c9   :  { %v2160_v51 = vadd.f32 %v2159_v0, %v2116_v16 }
 0x9cb   :  { %v2170_v29 = vadd.f32 %v2160_v51, %v3778_v25 }
 0x9cd   :  { %2179 = vst.msk [vmem:[%s4031_s7 + $0x40] sm:$0xf] %vm61_vm2, %v2170_v29 }

</bundles_post_ra>
